<compile_context>
chip_gen: v7x
topology: tpu7x:2x2x1
jax: 0.10.0
libtpu: 0.0.40
codegen_flags: <defaults>
</compile_context>

<pallas_src>
import jax
import jax.numpy as jnp
from jax.experimental import pallas as pl
from jax.experimental.pallas import tpu as pltpu

# encoder: 41 -> 128 -> 64 -> 12 -> 3 -> 1   (Tanh after every layer except the last)
# decoder:  1 ->   3 -> 12 -> 64 -> 128 -> 41 (Tanh after every layer except the last)
ENC_DIMS = [41, 128, 64, 12, 3, 1]
DEC_DIMS = [1, 3, 12, 64, 128, 41]
_LAYER_DIMS = list(zip(ENC_DIMS[:-1], ENC_DIMS[1:])) + list(zip(DEC_DIMS[:-1], DEC_DIMS[1:]))
_NUM_LAYERS = len(_LAYER_DIMS)          # 10
_ENC_OUT_LAYER = 4                      # Linear(3 -> 1): encoded output, no Tanh
_TINY = 12                              # fan_in<=12 and fan_out<=12 -> VPU chain, not MXU


def _round_up(n, m):
    return -(-n // m) * m


def _make_kernel(act_dtype):
    """Builds the kernel body; act_dtype is the carry dtype for wide-layer tanh."""

    def tiny_linear(h, w_ref, b_ref):
        # Unrolled VPU broadcast multiply-add chain: y = b + sum_k w[:, k] * h[k, :].
        # Avoids MXU push/pop bubbles for the bottleneck layers.
        w = w_ref[...].astype(jnp.float32)
        b = b_ref[...]
        h = h.astype(jnp.float32)
        in_dim = w.shape[1]
        y = w[:, 0:1] * h[0:1, :]
        for k in range(1, in_dim):
            y = y + w[:, k:k + 1] * h[k:k + 1, :]
        return y + b

    def mxu_linear(h, w_ref, b_ref):
        w = w_ref[...]
        if w.dtype != h.dtype:
            h = h.astype(w.dtype)
        y = jnp.dot(w, h, preferred_element_type=jnp.float32)
        return y + b_ref[...]

    def kernel(x_ref, *refs):
        # refs layout: 20 parameter refs (w0,b0,...,w9,b9), enc_out_ref, dec_out_ref
        param_refs = refs[:-2]
        enc_ref, dec_ref = refs[-2:]
        ws = param_refs[0::2]   # (out, in), wide ones may be bf16
        bs = param_refs[1::2]   # (out, 1) f32, except last which is (1, 41)

        # ---- layer 0: 41 -> 128, input relayout folded into the matmul ----
        # x block arrives batch-major (TB, 41); contracting the last dims of
        # w0 (128, 41) and x (TB, 41) yields feature-major (128, TB).
        w0 = ws[0][...]
        x = x_ref[...].astype(w0.dtype)
        h = jax.lax.dot_general(w0, x, (((1,), (1,)), ((), ())),
                                preferred_element_type=jnp.float32)
        h = jnp.tanh((h + bs[0][...]).astype(act_dtype))

        # ---- layers 1..8 in feature-major (out, TB) layout ----
        for i in range(1, _NUM_LAYERS - 1):
            fan_in, fan_out = _LAYER_DIMS[i]
            if fan_in <= _TINY and fan_out <= _TINY:
                h = tiny_linear(h, ws[i], bs[i])          # f32 VPU chain
            else:
                h = mxu_linear(h, ws[i], bs[i])           # MXU, f32 accumulate
            if i == _ENC_OUT_LAYER:
                enc_ref[...] = h                          # encoded (1, TB), lane-dense
            else:
                # Wide layers carry / tanh in act_dtype (bf16 on v6e/v7x);
                # tiny layers stay f32 everywhere.
                h = jnp.tanh(h.astype(act_dtype) if fan_out >= 64 else h)

        # ---- layer 9: 128 -> 41, emit decoded batch-major (TB, 41) ----
        w9 = ws[_NUM_LAYERS - 1][...]                     # (41, 128)
        b9 = bs[_NUM_LAYERS - 1][...]                     # (1, 41)
        d = h.astype(w9.dtype) if w9.dtype != h.dtype else h
        y = jax.lax.dot_general(d, w9, (((0,), (1,)), ((), ())),
                                preferred_element_type=jnp.float32)
        dec_ref[...] = y + b9                             # (TB, 41) — no wrapper transpose

    return kernel


def init_params(key):
    """Deterministic PyTorch-style (uniform +/- 1/sqrt(fan_in)) init.

    Weights are (out, in) (torch layout); biases are (out, 1).
    """
    params = []
    for fan_in, fan_out in _LAYER_DIMS:
        key, kw, kb = jax.random.split(key, 3)
        bound = 1.0 / float(fan_in) ** 0.5
        w = jax.random.uniform(kw, (fan_out, fan_in), jnp.float32, -bound, bound)
        b = jax.random.uniform(kb, (fan_out, 1), jnp.float32, -bound, bound)
        params += [w, b]
    return params


def _bf16_elementwise_ok():
    """bf16 VPU/EUP is native on v6e/v7x; emulated (slow) on v5e and older."""
    try:
        kind = jax.devices()[0].device_kind.lower()
    except Exception:
        return False
    return ("v6" in kind) or ("v7" in kind)


def autoencoder_forward(x, params, *, block_b=4096, use_bf16=True):
    """x: (B, 41) f32 -> (encoded (B, 1), decoded (B, 41)), both f32."""
    B, F = x.shape
    assert F == ENC_DIMS[0]

    # One-time wrapper-side prep: bf16 weights for the MXU-sized layers,
    # f32 for tiny layers; last-layer bias stored as a (1, 41) row so the
    # batch-major decoded store adds it directly.
    prep = []
    for idx, (fan_in, fan_out) in enumerate(_LAYER_DIMS):
        w, b = params[2 * idx], params[2 * idx + 1]
        if use_bf16 and max(fan_in, fan_out) >= 64:
            w = w.astype(jnp.bfloat16)
        else:
            w = w.astype(jnp.float32)
        b = b.astype(jnp.float32)
        if idx == _NUM_LAYERS - 1:
            b = b.reshape(1, fan_out)
        prep += [w, b]

    act_dtype = jnp.bfloat16 if (use_bf16 and _bf16_elementwise_ok()) else jnp.float32

    # ---- batch tiling: always 128-aligned; >= 2 grid steps for medium batches
    # so the "parallel" grid axis can shard across both TCs on v7x. ----
    B128 = _round_up(B, 128)
    if B128 <= 512:
        TB = B128                                   # single small tile
    elif B128 <= 2 * block_b:
        TB = _round_up(B128 // 2, 128)              # exactly-ish 2 tiles
    else:
        TB = block_b                                # many large tiles
    Bp = _round_up(B128, TB)
    grid = (Bp // TB,)

    x_p = x.astype(jnp.float32)
    if Bp != B:
        x_p = jnp.pad(x_p, ((0, Bp - B), (0, 0)))

    def const_spec(arr):
        # Parameters: full-array block, same block every grid step -> resident
        # in VMEM, no re-DMA across batch tiles.
        return pl.BlockSpec(arr.shape, lambda i: (0, 0))

    in_specs = [pl.BlockSpec((TB, F), lambda i: (i, 0))] + [const_spec(p) for p in prep]
    out_specs = (
        pl.BlockSpec((1, TB), lambda i: (0, i)),    # encoded (1, Bp), lane-dense
        pl.BlockSpec((TB, F), lambda i: (i, 0)),    # decoded (Bp, 41), batch-major
    )

    flops_per_row = 2 * sum(i * o for i, o in _LAYER_DIMS)
    trans_per_row = sum(ENC_DIMS[1:-1]) + sum(DEC_DIMS[1:-1])
    param_bytes = int(sum(p.size * p.dtype.itemsize for p in prep))
    cost = pl.CostEstimate(
        flops=flops_per_row * Bp,
        transcendentals=trans_per_row * Bp,
        bytes_accessed=(F + 1 + F) * 4 * Bp + param_bytes,
    )

    enc_t, dec_p = pl.pallas_call(
        _make_kernel(act_dtype),
        grid=grid,
        out_shape=(
            jax.ShapeDtypeStruct((1, Bp), jnp.float32),
            jax.ShapeDtypeStruct((Bp, F), jnp.float32),
        ),
        in_specs=in_specs,
        out_specs=out_specs,
        compiler_params=pltpu.CompilerParams(
            dimension_semantics=("parallel",),      # batch tiles across TCs (v7x)
            vmem_limit_bytes=64 * 1024 * 1024,      # headroom above v5e's 16 MiB default
        ),
        cost_estimate=cost,
    )(x_p, *prep)

    encoded = jnp.transpose(enc_t[:, :B])           # (B, 1) — only B floats, negligible
    decoded = dec_p[:B, :]                          # (B, 41) — already batch-major
    return encoded, decoded


def autoencoder_reference(x, params):
    """Pure-JAX f32 reference matching the torch module."""
    h = x
    for i in range(5):
        w, b = params[2 * i], params[2 * i + 1]
        h = h @ w.T + b[:, 0]
        if i < 4:
            h = jnp.tanh(h)
    enc = h
    d = h
    for i in range(5, 10):
        w, b = params[2 * i], params[2 * i + 1]
        d = d @ w.T + b[:, 0]
        if i < 9:
            d = jnp.tanh(d)
    return enc, d


if __name__ == "__main__":
    key = jax.random.PRNGKey(0)
    key_x, key_p = jax.random.split(key)

    B = 8
    x = jax.random.normal(key_x, (B, 41), dtype=jnp.float32)
    params = init_params(key_p)

    encoded, decoded = autoencoder_forward(x, params)
    jax.block_until_ready((encoded, decoded))

    assert encoded.shape == (B, 1) and decoded.shape == (B, 41)
    assert bool(jnp.all(jnp.isfinite(encoded))) and bool(jnp.all(jnp.isfinite(decoded)))

    # Loose tolerance: bf16 weights/activations on the wide layers are an
    # intentional, flag-gated precision tradeoff vs. the f32 reference.
    enc_ref, dec_ref = autoencoder_reference(x, params)
    assert bool(jnp.allclose(encoded, enc_ref, atol=5e-2)), "encoded mismatch vs reference"
    assert bool(jnp.allclose(decoded, dec_ref, atol=5e-2)), "decoded mismatch vs reference"

    print("KERNEL_OK")
</pallas_src>

<mosaic_0001>
module attributes {stable_mosaic.version = 11 : i64} {
  func.func @kernel(%arg0: i32, %arg1: memref<128x41xf32, #tpu.memory_space<vmem>>, %arg2: memref<128x41xbf16, #tpu.memory_space<vmem>>, %arg3: memref<128x1xf32, #tpu.memory_space<vmem>>, %arg4: memref<64x128xbf16, #tpu.memory_space<vmem>>, %arg5: memref<64x1xf32, #tpu.memory_space<vmem>>, %arg6: memref<12x64xbf16, #tpu.memory_space<vmem>>, %arg7: memref<12x1xf32, #tpu.memory_space<vmem>>, %arg8: memref<3x12xf32, #tpu.memory_space<vmem>>, %arg9: memref<3x1xf32, #tpu.memory_space<vmem>>, %arg10: memref<1x3xf32, #tpu.memory_space<vmem>>, %arg11: memref<1x1xf32, #tpu.memory_space<vmem>>, %arg12: memref<3x1xf32, #tpu.memory_space<vmem>>, %arg13: memref<3x1xf32, #tpu.memory_space<vmem>>, %arg14: memref<12x3xf32, #tpu.memory_space<vmem>>, %arg15: memref<12x1xf32, #tpu.memory_space<vmem>>, %arg16: memref<64x12xbf16, #tpu.memory_space<vmem>>, %arg17: memref<64x1xf32, #tpu.memory_space<vmem>>, %arg18: memref<128x64xbf16, #tpu.memory_space<vmem>>, %arg19: memref<128x1xf32, #tpu.memory_space<vmem>>, %arg20: memref<41x128xbf16, #tpu.memory_space<vmem>>, %arg21: memref<1x41xf32, #tpu.memory_space<vmem>>, %arg22: memref<1x128xf32, #tpu.memory_space<vmem>>, %arg23: memref<128x41xf32, #tpu.memory_space<vmem>>) attributes {dimension_semantics = [#tpu.dimension_semantics<parallel>], iteration_bounds = array<i64: 1>, scalar_prefetch = 0 : i64, scratch_operands = 0 : i64, tpu.core_type = #tpu.core_type<tc>, window_params = [{transform_indices = @transform_0, window_bounds = array<i64: 128, 41>}, {pipeline_mode = #tpu.pipeline_mode<synchronous>, transform_indices = @transform_1, window_bounds = array<i64: 128, 41>}, {pipeline_mode = #tpu.pipeline_mode<synchronous>, transform_indices = @transform_2, window_bounds = array<i64: 128, 1>}, {pipeline_mode = #tpu.pipeline_mode<synchronous>, transform_indices = @transform_3, window_bounds = array<i64: 64, 128>}, {pipeline_mode = #tpu.pipeline_mode<synchronous>, transform_indices = @transform_4, window_bounds = array<i64: 64, 1>}, {pipeline_mode = #tpu.pipeline_mode<synchronous>, transform_indices = @transform_5, window_bounds = array<i64: 12, 64>}, {pipeline_mode = #tpu.pipeline_mode<synchronous>, transform_indices = @transform_6, window_bounds = array<i64: 12, 1>}, {pipeline_mode = #tpu.pipeline_mode<synchronous>, transform_indices = @transform_7, window_bounds = array<i64: 3, 12>}, {pipeline_mode = #tpu.pipeline_mode<synchronous>, transform_indices = @transform_8, window_bounds = array<i64: 3, 1>}, {pipeline_mode = #tpu.pipeline_mode<synchronous>, transform_indices = @transform_9, window_bounds = array<i64: 1, 3>}, {pipeline_mode = #tpu.pipeline_mode<synchronous>, transform_indices = @transform_10, window_bounds = array<i64: 1, 1>}, {pipeline_mode = #tpu.pipeline_mode<synchronous>, transform_indices = @transform_11, window_bounds = array<i64: 3, 1>}, {pipeline_mode = #tpu.pipeline_mode<synchronous>, transform_indices = @transform_12, window_bounds = array<i64: 3, 1>}, {pipeline_mode = #tpu.pipeline_mode<synchronous>, transform_indices = @transform_13, window_bounds = array<i64: 12, 3>}, {pipeline_mode = #tpu.pipeline_mode<synchronous>, transform_indices = @transform_14, window_bounds = array<i64: 12, 1>}, {pipeline_mode = #tpu.pipeline_mode<synchronous>, transform_indices = @transform_15, window_bounds = array<i64: 64, 12>}, {pipeline_mode = #tpu.pipeline_mode<synchronous>, transform_indices = @transform_16, window_bounds = array<i64: 64, 1>}, {pipeline_mode = #tpu.pipeline_mode<synchronous>, transform_indices = @transform_17, window_bounds = array<i64: 128, 64>}, {pipeline_mode = #tpu.pipeline_mode<synchronous>, transform_indices = @transform_18, window_bounds = array<i64: 128, 1>}, {pipeline_mode = #tpu.pipeline_mode<synchronous>, transform_indices = @transform_19, window_bounds = array<i64: 41, 128>}, {pipeline_mode = #tpu.pipeline_mode<synchronous>, transform_indices = @transform_20, window_bounds = array<i64: 1, 41>}, {transform_indices = @transform_21, window_bounds = array<i64: 1, 128>}, {transform_indices = @transform_22, window_bounds = array<i64: 128, 41>}]} {
    %c0 = arith.constant 0 : index
    %c0_0 = arith.constant 0 : index
    %0 = vector.load %arg2[%c0, %c0_0] : memref<128x41xbf16, #tpu.memory_space<vmem>>, vector<128x41xbf16>
    %c0_1 = arith.constant 0 : index
    %c0_2 = arith.constant 0 : index
    %1 = vector.load %arg1[%c0_1, %c0_2] : memref<128x41xf32, #tpu.memory_space<vmem>>, vector<128x41xf32>
    %2 = arith.truncf %1 : vector<128x41xf32> to vector<128x41xbf16>
    %cst = arith.constant dense<0.000000e+00> : vector<128x128xf32>
    %3 = tpu.matmul %0, %2, %cst {dimension_numbers = #tpu.dot_dimension_numbers<[1], [1], [0], [0], [0, 0, 1, 0], [], []>} : vector<128x41xbf16>, vector<128x41xbf16>, vector<128x128xf32> -> vector<128x128xf32>
    %c0_3 = arith.constant 0 : index
    %c0_4 = arith.constant 0 : index
    %4 = vector.load %arg3[%c0_3, %c0_4] : memref<128x1xf32, #tpu.memory_space<vmem>>, vector<128x1xf32>
    %5 = vector.broadcast %4 : vector<128x1xf32> to vector<128x128xf32>
    %6 = arith.addf %3, %5 : vector<128x128xf32>
    %7 = math.tanh %6 : vector<128x128xf32>
    %c0_5 = arith.constant 0 : index
    %c0_6 = arith.constant 0 : index
    %8 = vector.load %arg4[%c0_5, %c0_6] : memref<64x128xbf16, #tpu.memory_space<vmem>>, vector<64x128xbf16>
    %9 = arith.truncf %7 : vector<128x128xf32> to vector<128x128xbf16>
    %cst_7 = arith.constant dense<0.000000e+00> : vector<64x128xf32>
    %10 = tpu.matmul %8, %9, %cst_7 {dimension_numbers = #tpu.dot_dimension_numbers<[1], [0], [0], [1], [0, 0, 1, 1], [], []>} : vector<64x128xbf16>, vector<128x128xbf16>, vector<64x128xf32> -> vector<64x128xf32>
    %c0_8 = arith.constant 0 : index
    %c0_9 = arith.constant 0 : index
    %11 = vector.load %arg5[%c0_8, %c0_9] : memref<64x1xf32, #tpu.memory_space<vmem>>, vector<64x1xf32>
    %12 = vector.broadcast %11 : vector<64x1xf32> to vector<64x128xf32>
    %13 = arith.addf %10, %12 : vector<64x128xf32>
    %14 = math.tanh %13 : vector<64x128xf32>
    %c0_10 = arith.constant 0 : index
    %c0_11 = arith.constant 0 : index
    %15 = vector.load %arg6[%c0_10, %c0_11] : memref<12x64xbf16, #tpu.memory_space<vmem>>, vector<12x64xbf16>
    %16 = arith.truncf %14 : vector<64x128xf32> to vector<64x128xbf16>
    %cst_12 = arith.constant dense<0.000000e+00> : vector<12x128xf32>
    %17 = tpu.matmul %15, %16, %cst_12 {dimension_numbers = #tpu.dot_dimension_numbers<[1], [0], [0], [1], [0, 0, 1, 1], [], []>} : vector<12x64xbf16>, vector<64x128xbf16>, vector<12x128xf32> -> vector<12x128xf32>
    %c0_13 = arith.constant 0 : index
    %c0_14 = arith.constant 0 : index
    %18 = vector.load %arg7[%c0_13, %c0_14] : memref<12x1xf32, #tpu.memory_space<vmem>>, vector<12x1xf32>
    %19 = vector.broadcast %18 : vector<12x1xf32> to vector<12x128xf32>
    %20 = arith.addf %17, %19 : vector<12x128xf32>
    %21 = math.tanh %20 : vector<12x128xf32>
    %c0_15 = arith.constant 0 : index
    %c0_16 = arith.constant 0 : index
    %22 = vector.load %arg8[%c0_15, %c0_16] : memref<3x12xf32, #tpu.memory_space<vmem>>, vector<3x12xf32>
    %c0_17 = arith.constant 0 : index
    %c0_18 = arith.constant 0 : index
    %23 = vector.load %arg9[%c0_17, %c0_18] : memref<3x1xf32, #tpu.memory_space<vmem>>, vector<3x1xf32>
    %24 = vector.extract_strided_slice %22 {offsets = [0, 0], sizes = [3, 1], strides = [1, 1]} : vector<3x12xf32> to vector<3x1xf32>
    %25 = vector.extract_strided_slice %21 {offsets = [0, 0], sizes = [1, 128], strides = [1, 1]} : vector<12x128xf32> to vector<1x128xf32>
    %26 = vector.broadcast %24 : vector<3x1xf32> to vector<3x128xf32>
    %27 = vector.broadcast %25 : vector<1x128xf32> to vector<3x128xf32>
    %28 = arith.mulf %26, %27 : vector<3x128xf32>
    %29 = vector.extract_strided_slice %22 {offsets = [0, 1], sizes = [3, 1], strides = [1, 1]} : vector<3x12xf32> to vector<3x1xf32>
    %30 = vector.extract_strided_slice %21 {offsets = [1, 0], sizes = [1, 128], strides = [1, 1]} : vector<12x128xf32> to vector<1x128xf32>
    %31 = vector.broadcast %29 : vector<3x1xf32> to vector<3x128xf32>
    %32 = vector.broadcast %30 : vector<1x128xf32> to vector<3x128xf32>
    %33 = arith.mulf %31, %32 : vector<3x128xf32>
    %34 = arith.addf %28, %33 : vector<3x128xf32>
    %35 = vector.extract_strided_slice %22 {offsets = [0, 2], sizes = [3, 1], strides = [1, 1]} : vector<3x12xf32> to vector<3x1xf32>
    %36 = vector.extract_strided_slice %21 {offsets = [2, 0], sizes = [1, 128], strides = [1, 1]} : vector<12x128xf32> to vector<1x128xf32>
    %37 = vector.broadcast %35 : vector<3x1xf32> to vector<3x128xf32>
    %38 = vector.broadcast %36 : vector<1x128xf32> to vector<3x128xf32>
    %39 = arith.mulf %37, %38 : vector<3x128xf32>
    %40 = arith.addf %34, %39 : vector<3x128xf32>
    %41 = vector.extract_strided_slice %22 {offsets = [0, 3], sizes = [3, 1], strides = [1, 1]} : vector<3x12xf32> to vector<3x1xf32>
    %42 = vector.extract_strided_slice %21 {offsets = [3, 0], sizes = [1, 128], strides = [1, 1]} : vector<12x128xf32> to vector<1x128xf32>
    %43 = vector.broadcast %41 : vector<3x1xf32> to vector<3x128xf32>
    %44 = vector.broadcast %42 : vector<1x128xf32> to vector<3x128xf32>
    %45 = arith.mulf %43, %44 : vector<3x128xf32>
    %46 = arith.addf %40, %45 : vector<3x128xf32>
    %47 = vector.extract_strided_slice %22 {offsets = [0, 4], sizes = [3, 1], strides = [1, 1]} : vector<3x12xf32> to vector<3x1xf32>
    %48 = vector.extract_strided_slice %21 {offsets = [4, 0], sizes = [1, 128], strides = [1, 1]} : vector<12x128xf32> to vector<1x128xf32>
    %49 = vector.broadcast %47 : vector<3x1xf32> to vector<3x128xf32>
    %50 = vector.broadcast %48 : vector<1x128xf32> to vector<3x128xf32>
    %51 = arith.mulf %49, %50 : vector<3x128xf32>
    %52 = arith.addf %46, %51 : vector<3x128xf32>
    %53 = vector.extract_strided_slice %22 {offsets = [0, 5], sizes = [3, 1], strides = [1, 1]} : vector<3x12xf32> to vector<3x1xf32>
    %54 = vector.extract_strided_slice %21 {offsets = [5, 0], sizes = [1, 128], strides = [1, 1]} : vector<12x128xf32> to vector<1x128xf32>
    %55 = vector.broadcast %53 : vector<3x1xf32> to vector<3x128xf32>
    %56 = vector.broadcast %54 : vector<1x128xf32> to vector<3x128xf32>
    %57 = arith.mulf %55, %56 : vector<3x128xf32>
    %58 = arith.addf %52, %57 : vector<3x128xf32>
    %59 = vector.extract_strided_slice %22 {offsets = [0, 6], sizes = [3, 1], strides = [1, 1]} : vector<3x12xf32> to vector<3x1xf32>
    %60 = vector.extract_strided_slice %21 {offsets = [6, 0], sizes = [1, 128], strides = [1, 1]} : vector<12x128xf32> to vector<1x128xf32>
    %61 = vector.broadcast %59 : vector<3x1xf32> to vector<3x128xf32>
    %62 = vector.broadcast %60 : vector<1x128xf32> to vector<3x128xf32>
    %63 = arith.mulf %61, %62 : vector<3x128xf32>
    %64 = arith.addf %58, %63 : vector<3x128xf32>
    %65 = vector.extract_strided_slice %22 {offsets = [0, 7], sizes = [3, 1], strides = [1, 1]} : vector<3x12xf32> to vector<3x1xf32>
    %66 = vector.extract_strided_slice %21 {offsets = [7, 0], sizes = [1, 128], strides = [1, 1]} : vector<12x128xf32> to vector<1x128xf32>
    %67 = vector.broadcast %65 : vector<3x1xf32> to vector<3x128xf32>
    %68 = vector.broadcast %66 : vector<1x128xf32> to vector<3x128xf32>
    %69 = arith.mulf %67, %68 : vector<3x128xf32>
    %70 = arith.addf %64, %69 : vector<3x128xf32>
    %71 = vector.extract_strided_slice %22 {offsets = [0, 8], sizes = [3, 1], strides = [1, 1]} : vector<3x12xf32> to vector<3x1xf32>
    %72 = vector.extract_strided_slice %21 {offsets = [8, 0], sizes = [1, 128], strides = [1, 1]} : vector<12x128xf32> to vector<1x128xf32>
    %73 = vector.broadcast %71 : vector<3x1xf32> to vector<3x128xf32>
    %74 = vector.broadcast %72 : vector<1x128xf32> to vector<3x128xf32>
    %75 = arith.mulf %73, %74 : vector<3x128xf32>
    %76 = arith.addf %70, %75 : vector<3x128xf32>
    %77 = vector.extract_strided_slice %22 {offsets = [0, 9], sizes = [3, 1], strides = [1, 1]} : vector<3x12xf32> to vector<3x1xf32>
    %78 = vector.extract_strided_slice %21 {offsets = [9, 0], sizes = [1, 128], strides = [1, 1]} : vector<12x128xf32> to vector<1x128xf32>
    %79 = vector.broadcast %77 : vector<3x1xf32> to vector<3x128xf32>
    %80 = vector.broadcast %78 : vector<1x128xf32> to vector<3x128xf32>
    %81 = arith.mulf %79, %80 : vector<3x128xf32>
    %82 = arith.addf %76, %81 : vector<3x128xf32>
    %83 = vector.extract_strided_slice %22 {offsets = [0, 10], sizes = [3, 1], strides = [1, 1]} : vector<3x12xf32> to vector<3x1xf32>
    %84 = vector.extract_strided_slice %21 {offsets = [10, 0], sizes = [1, 128], strides = [1, 1]} : vector<12x128xf32> to vector<1x128xf32>
    %85 = vector.broadcast %83 : vector<3x1xf32> to vector<3x128xf32>
    %86 = vector.broadcast %84 : vector<1x128xf32> to vector<3x128xf32>
    %87 = arith.mulf %85, %86 : vector<3x128xf32>
    %88 = arith.addf %82, %87 : vector<3x128xf32>
    %89 = vector.extract_strided_slice %22 {offsets = [0, 11], sizes = [3, 1], strides = [1, 1]} : vector<3x12xf32> to vector<3x1xf32>
    %90 = vector.extract_strided_slice %21 {offsets = [11, 0], sizes = [1, 128], strides = [1, 1]} : vector<12x128xf32> to vector<1x128xf32>
    %91 = vector.broadcast %89 : vector<3x1xf32> to vector<3x128xf32>
    %92 = vector.broadcast %90 : vector<1x128xf32> to vector<3x128xf32>
    %93 = arith.mulf %91, %92 : vector<3x128xf32>
    %94 = arith.addf %88, %93 : vector<3x128xf32>
    %95 = vector.broadcast %23 : vector<3x1xf32> to vector<3x128xf32>
    %96 = arith.addf %94, %95 : vector<3x128xf32>
    %97 = math.tanh %96 : vector<3x128xf32>
    %c0_19 = arith.constant 0 : index
    %c0_20 = arith.constant 0 : index
    %98 = vector.load %arg10[%c0_19, %c0_20] : memref<1x3xf32, #tpu.memory_space<vmem>>, vector<1x3xf32>
    %c0_21 = arith.constant 0 : index
    %c0_22 = arith.constant 0 : index
    %99 = vector.load %arg11[%c0_21, %c0_22] : memref<1x1xf32, #tpu.memory_space<vmem>>, vector<1x1xf32>
    %100 = vector.extract_strided_slice %98 {offsets = [0, 0], sizes = [1, 1], strides = [1, 1]} : vector<1x3xf32> to vector<1x1xf32>
    %101 = vector.extract_strided_slice %97 {offsets = [0, 0], sizes = [1, 128], strides = [1, 1]} : vector<3x128xf32> to vector<1x128xf32>
    %102 = vector.broadcast %100 : vector<1x1xf32> to vector<1x128xf32>
    %103 = arith.mulf %102, %101 : vector<1x128xf32>
    %104 = vector.extract_strided_slice %98 {offsets = [0, 1], sizes = [1, 1], strides = [1, 1]} : vector<1x3xf32> to vector<1x1xf32>
    %105 = vector.extract_strided_slice %97 {offsets = [1, 0], sizes = [1, 128], strides = [1, 1]} : vector<3x128xf32> to vector<1x128xf32>
    %106 = vector.broadcast %104 : vector<1x1xf32> to vector<1x128xf32>
    %107 = arith.mulf %106, %105 : vector<1x128xf32>
    %108 = arith.addf %103, %107 : vector<1x128xf32>
    %109 = vector.extract_strided_slice %98 {offsets = [0, 2], sizes = [1, 1], strides = [1, 1]} : vector<1x3xf32> to vector<1x1xf32>
    %110 = vector.extract_strided_slice %97 {offsets = [2, 0], sizes = [1, 128], strides = [1, 1]} : vector<3x128xf32> to vector<1x128xf32>
    %111 = vector.broadcast %109 : vector<1x1xf32> to vector<1x128xf32>
    %112 = arith.mulf %111, %110 : vector<1x128xf32>
    %113 = arith.addf %108, %112 : vector<1x128xf32>
    %114 = vector.broadcast %99 : vector<1x1xf32> to vector<1x128xf32>
    %115 = arith.addf %113, %114 : vector<1x128xf32>
    %c0_23 = arith.constant 0 : index
    %c0_24 = arith.constant 0 : index
    %116 = vector.load %arg22[%c0_23, %c0_24] : memref<1x128xf32, #tpu.memory_space<vmem>>, vector<1x128xf32>
    tpu.vector_store %arg22[%c0_23, %c0_24], %115 {strides = array<i32>} : memref<1x128xf32, #tpu.memory_space<vmem>>, vector<1x128xf32>,
    %c0_25 = arith.constant 0 : index
    %c0_26 = arith.constant 0 : index
    %117 = vector.load %arg12[%c0_25, %c0_26] : memref<3x1xf32, #tpu.memory_space<vmem>>, vector<3x1xf32>
    %c0_27 = arith.constant 0 : index
    %c0_28 = arith.constant 0 : index
    %118 = vector.load %arg13[%c0_27, %c0_28] : memref<3x1xf32, #tpu.memory_space<vmem>>, vector<3x1xf32>
    %119 = vector.broadcast %117 : vector<3x1xf32> to vector<3x128xf32>
    %120 = vector.broadcast %115 : vector<1x128xf32> to vector<3x128xf32>
    %121 = arith.mulf %119, %120 : vector<3x128xf32>
    %122 = vector.broadcast %118 : vector<3x1xf32> to vector<3x128xf32>
    %123 = arith.addf %121, %122 : vector<3x128xf32>
    %124 = math.tanh %123 : vector<3x128xf32>
    %c0_29 = arith.constant 0 : index
    %c0_30 = arith.constant 0 : index
    %125 = vector.load %arg14[%c0_29, %c0_30] : memref<12x3xf32, #tpu.memory_space<vmem>>, vector<12x3xf32>
    %c0_31 = arith.constant 0 : index
    %c0_32 = arith.constant 0 : index
    %126 = vector.load %arg15[%c0_31, %c0_32] : memref<12x1xf32, #tpu.memory_space<vmem>>, vector<12x1xf32>
    %127 = vector.extract_strided_slice %125 {offsets = [0, 0], sizes = [12, 1], strides = [1, 1]} : vector<12x3xf32> to vector<12x1xf32>
    %128 = vector.extract_strided_slice %124 {offsets = [0, 0], sizes = [1, 128], strides = [1, 1]} : vector<3x128xf32> to vector<1x128xf32>
    %129 = vector.broadcast %127 : vector<12x1xf32> to vector<12x128xf32>
    %130 = vector.broadcast %128 : vector<1x128xf32> to vector<12x128xf32>
    %131 = arith.mulf %129, %130 : vector<12x128xf32>
    %132 = vector.extract_strided_slice %125 {offsets = [0, 1], sizes = [12, 1], strides = [1, 1]} : vector<12x3xf32> to vector<12x1xf32>
    %133 = vector.extract_strided_slice %124 {offsets = [1, 0], sizes = [1, 128], strides = [1, 1]} : vector<3x128xf32> to vector<1x128xf32>
    %134 = vector.broadcast %132 : vector<12x1xf32> to vector<12x128xf32>
    %135 = vector.broadcast %133 : vector<1x128xf32> to vector<12x128xf32>
    %136 = arith.mulf %134, %135 : vector<12x128xf32>
    %137 = arith.addf %131, %136 : vector<12x128xf32>
    %138 = vector.extract_strided_slice %125 {offsets = [0, 2], sizes = [12, 1], strides = [1, 1]} : vector<12x3xf32> to vector<12x1xf32>
    %139 = vector.extract_strided_slice %124 {offsets = [2, 0], sizes = [1, 128], strides = [1, 1]} : vector<3x128xf32> to vector<1x128xf32>
    %140 = vector.broadcast %138 : vector<12x1xf32> to vector<12x128xf32>
    %141 = vector.broadcast %139 : vector<1x128xf32> to vector<12x128xf32>
    %142 = arith.mulf %140, %141 : vector<12x128xf32>
    %143 = arith.addf %137, %142 : vector<12x128xf32>
    %144 = vector.broadcast %126 : vector<12x1xf32> to vector<12x128xf32>
    %145 = arith.addf %143, %144 : vector<12x128xf32>
    %146 = math.tanh %145 : vector<12x128xf32>
    %c0_33 = arith.constant 0 : index
    %c0_34 = arith.constant 0 : index
    %147 = vector.load %arg16[%c0_33, %c0_34] : memref<64x12xbf16, #tpu.memory_space<vmem>>, vector<64x12xbf16>
    %148 = arith.truncf %146 : vector<12x128xf32> to vector<12x128xbf16>
    %cst_35 = arith.constant dense<0.000000e+00> : vector<64x128xf32>
    %149 = tpu.matmul %147, %148, %cst_35 {dimension_numbers = #tpu.dot_dimension_numbers<[1], [0], [0], [1], [0, 0, 1, 1], [], []>} : vector<64x12xbf16>, vector<12x128xbf16>, vector<64x128xf32> -> vector<64x128xf32>
    %c0_36 = arith.constant 0 : index
    %c0_37 = arith.constant 0 : index
    %150 = vector.load %arg17[%c0_36, %c0_37] : memref<64x1xf32, #tpu.memory_space<vmem>>, vector<64x1xf32>
    %151 = vector.broadcast %150 : vector<64x1xf32> to vector<64x128xf32>
    %152 = arith.addf %149, %151 : vector<64x128xf32>
    %153 = math.tanh %152 : vector<64x128xf32>
    %c0_38 = arith.constant 0 : index
    %c0_39 = arith.constant 0 : index
    %154 = vector.load %arg18[%c0_38, %c0_39] : memref<128x64xbf16, #tpu.memory_space<vmem>>, vector<128x64xbf16>
    %155 = arith.truncf %153 : vector<64x128xf32> to vector<64x128xbf16>
    %cst_40 = arith.constant dense<0.000000e+00> : vector<128x128xf32>
    %156 = tpu.matmul %154, %155, %cst_40 {dimension_numbers = #tpu.dot_dimension_numbers<[1], [0], [0], [1], [0, 0, 1, 1], [], []>} : vector<128x64xbf16>, vector<64x128xbf16>, vector<128x128xf32> -> vector<128x128xf32>
    %c0_41 = arith.constant 0 : index
    %c0_42 = arith.constant 0 : index
    %157 = vector.load %arg19[%c0_41, %c0_42] : memref<128x1xf32, #tpu.memory_space<vmem>>, vector<128x1xf32>
    %158 = vector.broadcast %157 : vector<128x1xf32> to vector<128x128xf32>
    %159 = arith.addf %156, %158 : vector<128x128xf32>
    %160 = math.tanh %159 : vector<128x128xf32>
    %c0_43 = arith.constant 0 : index
    %c0_44 = arith.constant 0 : index
    %161 = vector.load %arg20[%c0_43, %c0_44] : memref<41x128xbf16, #tpu.memory_space<vmem>>, vector<41x128xbf16>
    %c0_45 = arith.constant 0 : index
    %c0_46 = arith.constant 0 : index
    %162 = vector.load %arg21[%c0_45, %c0_46] : memref<1x41xf32, #tpu.memory_space<vmem>>, vector<1x41xf32>
    %163 = arith.truncf %160 : vector<128x128xf32> to vector<128x128xbf16>
    %cst_47 = arith.constant dense<0.000000e+00> : vector<128x41xf32>
    %164 = tpu.matmul %163, %161, %cst_47 {dimension_numbers = #tpu.dot_dimension_numbers<[0], [1], [1], [0], [0, 1, 1, 0], [], []>} : vector<128x128xbf16>, vector<41x128xbf16>, vector<128x41xf32> -> vector<128x41xf32>
    %165 = vector.broadcast %162 : vector<1x41xf32> to vector<128x41xf32>
    %166 = arith.addf %164, %165 : vector<128x41xf32>
    %c0_48 = arith.constant 0 : index
    %c0_49 = arith.constant 0 : index
    %167 = vector.load %arg23[%c0_48, %c0_49] : memref<128x41xf32, #tpu.memory_space<vmem>>, vector<128x41xf32>
    tpu.vector_store %arg23[%c0_48, %c0_49], %166 {strides = array<i32>} : memref<128x41xf32, #tpu.memory_space<vmem>>, vector<128x41xf32>,
    return
  }
  func.func @transform_0(%arg0: i32) -> (i32, i32) {
    %c0_i32 = arith.constant 0 : i32
    %c0_i32_0 = arith.constant 0 : i32
    return %arg0, %c0_i32 : i32, i32
  }
  func.func @transform_1(%arg0: i32) -> (i32, i32) {
    %c0_i32 = arith.constant 0 : i32
    %c0_i32_0 = arith.constant 0 : i32
    %c0_i32_1 = arith.constant 0 : i32
    return %c0_i32, %c0_i32_0 : i32, i32
  }
  func.func @transform_2(%arg0: i32) -> (i32, i32) {
    %c0_i32 = arith.constant 0 : i32
    %c0_i32_0 = arith.constant 0 : i32
    %c0_i32_1 = arith.constant 0 : i32
    return %c0_i32, %c0_i32_0 : i32, i32
  }
  func.func @transform_3(%arg0: i32) -> (i32, i32) {
    %c0_i32 = arith.constant 0 : i32
    %c0_i32_0 = arith.constant 0 : i32
    %c0_i32_1 = arith.constant 0 : i32
    return %c0_i32, %c0_i32_0 : i32, i32
  }
  func.func @transform_4(%arg0: i32) -> (i32, i32) {
    %c0_i32 = arith.constant 0 : i32
    %c0_i32_0 = arith.constant 0 : i32
    %c0_i32_1 = arith.constant 0 : i32
    return %c0_i32, %c0_i32_0 : i32, i32
  }
  func.func @transform_5(%arg0: i32) -> (i32, i32) {
    %c0_i32 = arith.constant 0 : i32
    %c0_i32_0 = arith.constant 0 : i32
    %c0_i32_1 = arith.constant 0 : i32
    return %c0_i32, %c0_i32_0 : i32, i32
  }
  func.func @transform_6(%arg0: i32) -> (i32, i32) {
    %c0_i32 = arith.constant 0 : i32
    %c0_i32_0 = arith.constant 0 : i32
    %c0_i32_1 = arith.constant 0 : i32
    return %c0_i32, %c0_i32_0 : i32, i32
  }
  func.func @transform_7(%arg0: i32) -> (i32, i32) {
    %c0_i32 = arith.constant 0 : i32
    %c0_i32_0 = arith.constant 0 : i32
    %c0_i32_1 = arith.constant 0 : i32
    return %c0_i32, %c0_i32_0 : i32, i32
  }
  func.func @transform_8(%arg0: i32) -> (i32, i32) {
    %c0_i32 = arith.constant 0 : i32
    %c0_i32_0 = arith.constant 0 : i32
    %c0_i32_1 = arith.constant 0 : i32
    return %c0_i32, %c0_i32_0 : i32, i32
  }
  func.func @transform_9(%arg0: i32) -> (i32, i32) {
    %c0_i32 = arith.constant 0 : i32
    %c0_i32_0 = arith.constant 0 : i32
    %c0_i32_1 = arith.constant 0 : i32
    return %c0_i32, %c0_i32_0 : i32, i32
  }
  func.func @transform_10(%arg0: i32) -> (i32, i32) {
    %c0_i32 = arith.constant 0 : i32
    %c0_i32_0 = arith.constant 0 : i32
    %c0_i32_1 = arith.constant 0 : i32
    return %c0_i32, %c0_i32_0 : i32, i32
  }
  func.func @transform_11(%arg0: i32) -> (i32, i32) {
    %c0_i32 = arith.constant 0 : i32
    %c0_i32_0 = arith.constant 0 : i32
    %c0_i32_1 = arith.constant 0 : i32
    return %c0_i32, %c0_i32_0 : i32, i32
  }
  func.func @transform_12(%arg0: i32) -> (i32, i32) {
    %c0_i32 = arith.constant 0 : i32
    %c0_i32_0 = arith.constant 0 : i32
    %c0_i32_1 = arith.constant 0 : i32
    return %c0_i32, %c0_i32_0 : i32, i32
  }
  func.func @transform_13(%arg0: i32) -> (i32, i32) {
    %c0_i32 = arith.constant 0 : i32
    %c0_i32_0 = arith.constant 0 : i32
    %c0_i32_1 = arith.constant 0 : i32
    return %c0_i32, %c0_i32_0 : i32, i32
  }
  func.func @transform_14(%arg0: i32) -> (i32, i32) {
    %c0_i32 = arith.constant 0 : i32
    %c0_i32_0 = arith.constant 0 : i32
    %c0_i32_1 = arith.constant 0 : i32
    return %c0_i32, %c0_i32_0 : i32, i32
  }
  func.func @transform_15(%arg0: i32) -> (i32, i32) {
    %c0_i32 = arith.constant 0 : i32
    %c0_i32_0 = arith.constant 0 : i32
    %c0_i32_1 = arith.constant 0 : i32
    return %c0_i32, %c0_i32_0 : i32, i32
  }
  func.func @transform_16(%arg0: i32) -> (i32, i32) {
    %c0_i32 = arith.constant 0 : i32
    %c0_i32_0 = arith.constant 0 : i32
    %c0_i32_1 = arith.constant 0 : i32
    return %c0_i32, %c0_i32_0 : i32, i32
  }
  func.func @transform_17(%arg0: i32) -> (i32, i32) {
    %c0_i32 = arith.constant 0 : i32
    %c0_i32_0 = arith.constant 0 : i32
    %c0_i32_1 = arith.constant 0 : i32
    return %c0_i32, %c0_i32_0 : i32, i32
  }
  func.func @transform_18(%arg0: i32) -> (i32, i32) {
    %c0_i32 = arith.constant 0 : i32
    %c0_i32_0 = arith.constant 0 : i32
    %c0_i32_1 = arith.constant 0 : i32
    return %c0_i32, %c0_i32_0 : i32, i32
  }
  func.func @transform_19(%arg0: i32) -> (i32, i32) {
    %c0_i32 = arith.constant 0 : i32
    %c0_i32_0 = arith.constant 0 : i32
    %c0_i32_1 = arith.constant 0 : i32
    return %c0_i32, %c0_i32_0 : i32, i32
  }
  func.func @transform_20(%arg0: i32) -> (i32, i32) {
    %c0_i32 = arith.constant 0 : i32
    %c0_i32_0 = arith.constant 0 : i32
    %c0_i32_1 = arith.constant 0 : i32
    return %c0_i32, %c0_i32_0 : i32, i32
  }
  func.func @transform_21(%arg0: i32) -> (i32, i32) {
    %c0_i32 = arith.constant 0 : i32
    %c0_i32_0 = arith.constant 0 : i32
    return %c0_i32, %arg0 : i32, i32
  }
  func.func @transform_22(%arg0: i32) -> (i32, i32) {
    %c0_i32 = arith.constant 0 : i32
    %c0_i32_0 = arith.constant 0 : i32
    return %arg0, %c0_i32 : i32, i32
  }
}

</mosaic_0001>

<bundles_post_ra>
// kernel: tpu_custom_call.1
= control target key start
LH: loop header
LB: loop body
LE: loop exit
PB: predicated region body
PF: predicated region fallthrough
CT: control target
= control target key end

     0   :  { %s3406_s0 = inlined_call_operand.hbm [shape: f32[128,41], index: 0, kind: input, shape index: {}]   ;;  %s3407_s1 = inlined_call_operand.hbm [shape: bf16[128,41], index: 1, kind: input, shape index: {}]   ;;  %s3408_s2 = inlined_call_operand.hbm [shape: f32[128,1], index: 2, kind: input, shape index: {}]   ;;  %s3409_s3 = inlined_call_operand.hbm [shape: bf16[64,128], index: 3, kind: input, shape index: {}]   ;;  %s3410_s4 = inlined_call_operand.hbm [shape: f32[64,1], index: 4, kind: input, shape index: {}]   ;;  %s3411_s5 = inlined_call_operand.hbm [shape: bf16[12,64], index: 5, kind: input, shape index: {}]   ;;  %s3412_s6 = inlined_call_operand.hbm [shape: f32[12,1], index: 6, kind: input, shape index: {}]   ;;  %s3413_s7 = inlined_call_operand.hbm [shape: f32[3,12], index: 7, kind: input, shape index: {}]   ;;  %s3414_s8 = inlined_call_operand.hbm [shape: f32[3,1], index: 8, kind: input, shape index: {}]   ;;  %s3415_s9 = inlined_call_operand.hbm [shape: f32[1,3], index: 9, kind: input, shape index: {}]   ;;  %s3416_s10 = inlined_call_operand.<no memory space> [shape: f32[1,1], index: 10, kind: input, shape index: {}]   ;;  %s3417_s11 = inlined_call_operand.hbm [shape: f32[3,1], index: 11, kind: input, shape index: {}]   ;;  %s3418_s12 = inlined_call_operand.hbm [shape: f32[3,1], index: 12, kind: input, shape index: {}]   ;;  %s3419_s13 = inlined_call_operand.hbm [shape: f32[12,3], index: 13, kind: input, shape index: {}]   ;;  %s3420_s14 = inlined_call_operand.hbm [shape: f32[12,1], index: 14, kind: input, shape index: {}]   ;;  %s3421_s15 = inlined_call_operand.hbm [shape: bf16[64,12], index: 15, kind: input, shape index: {}]   ;;  %s3422_s16 = inlined_call_operand.hbm [shape: f32[64,1], index: 16, kind: input, shape index: {}]   ;;  %s3423_s17 = inlined_call_operand.hbm [shape: bf16[128,64], index: 17, kind: input, shape index: {}]   ;;  %s3424_s18 = inlined_call_operand.hbm [shape: f32[128,1], index: 18, kind: input, shape index: {}]   ;;  %s3425_s19 = inlined_call_operand.hbm [shape: bf16[41,128], index: 19, kind: input, shape index: {}]   ;;  %s3426_s20 = inlined_call_operand.hbm [shape: f32[1,41], index: 20, kind: input, shape index: {}]   ;;  %s3427_s21 = inlined_call_operand.hbm [shape: f32[1,128], index: 21, kind: output, shape index: {0}]   ;;  %s3428_s22 = inlined_call_operand.hbm [shape: f32[128,41], index: 22, kind: output, shape index: {1}]  }
   0x1   :  { %3438 = sst [smem:[#allocation51_spill]] %s3406_s0  ;;  %v28_v0 = vstv %s3416_s10 }
   0x2   :  { %3439 = sst [smem:[#allocation52_spill]] %s3407_s1  ;;  %29 = vst [vmem:[#allocation2] sm:$0x1] %v28_v0 }
   0x3   :  { %3440 = sst [smem:[#allocation53_spill]] %s3408_s2 }
   0x4   :  { %3441 = sst [smem:[#allocation54_spill]] %s3409_s3 }
   0x5   :  { %3442 = sst [smem:[#allocation55_spill]] %s3410_s4 }
   0x6   :  { %3443 = sst [smem:[#allocation56_spill]] %s3411_s5 }
   0x7   :  { %3444 = sst [smem:[#allocation57_spill]] %s3412_s6 }
   0x8   :  { %3445 = sst [smem:[#allocation58_spill]] %s3427_s21 }
   0x9   :  { %3446 = sst [smem:[#allocation59_spill]] %s3428_s22 }
   0xa   :  { %30 = vsyncpa [#allocation4], 0 }
   0xb   :  { %31 = vsyncpa [#allocation7], 0 }
   0xc   :  { %32 = vsyncpa [#allocation10], 0 }
   0xd   :  { %33 = vsyncpa [#allocation13], 0 }
   0xe   :  { %34 = vsyncpa [#allocation16], 0 }
   0xf   :  { %35 = vsyncpa [#allocation19], 0 }
  0x10   :  { %36 = vsyncpa [#allocation22], 0 }
  0x11   :  { %37 = vsyncpa [#allocation25], 0 }
  0x12   :  { %38 = vsyncpa [#allocation28], 0 }
  0x13   :  { %39 = vsyncpa [#allocation31], 0 }
  0x14   :  { %40 = vsyncpa [#allocation34], 0 }
  0x15   :  { %41 = vsyncpa [#allocation5], 0 }
  0x16   :  { %42 = vsyncpa [#allocation37], 0  ;;  %s2795_s29 = smov [#allocation6]   ;;  %s3447_s10 = sld [smem:[#allocation52_spill]] }
  0x17   :  { %s60_s30 = sshll.u32 %s2795_s29, 4  ;;  %s61_s30 = int_to_ptr.vmem [resolvable:$true] %s60_s30 }
  0x1c   :  { %s2285_s23 = scalar_lea.hbm %s3447_s10, 1024 }
  0x1d   :  { %p2286_p0 = scmp.ne.s32.totalorder %s3447_s10, %s2285_s23  ;;  %p2289_p1 = scmp.lt.u32.totalorder %s2285_s23, %s3447_s10 }
  0x1f   :  { %p2291_p2 = pnand %p2289_p1, %p2286_p0 }
  0x21   :  { %2294 = shalt.err (!%p2291_p2)
}
  0x22   :  { %s2295_s25 = scalar_lea.vmem %s61_s30, 1024  ;;  %p2300_p4 = scmp.lt.s32.totalorder %s61_s30, %s61_s30 }
  0x23   :  { %p2296_p3 = scmp.ne.s32.totalorder %s61_s30, %s2295_s25  ;;  %p2301_p5 = scmp.lt.s32.totalorder %s2295_s25, %s2295_s25 }
  0x25   :  { %p2302_p6 = por %p2301_p5, %p2300_p4 }
  0x27   :  { %p2303_p7 = pnand %p2302_p6, %p2296_p3 }
  0x29   :  { %2306 = shalt.err (!%p2303_p7)
}
  0x2a   :  { %s2796_s26 = smov 64   ;;  %s2797_s2 = smov 4  }
  0x2b   :  { %66 = dma.hbm_to_vmem [thread:$0]  %s3447_s10, 1024, %s61_s30, [#allocation7], %s2796_s26, %s2796_s26, %s2797_s2  }
  0x2c   :  { %s2798_s28 = smov [#allocation9]   ;;  %s2799_s4 = smov [#allocation12]  }
  0x2d   :  { %s84_s29 = sshll.u32 %s2798_s28, 4  ;;  %s108_s0 = sshll.u32 %s2799_s4, 4  ;;  %s85_s29 = int_to_ptr.vmem [resolvable:$true] %s84_s29  ;;  %s109_s0 = int_to_ptr.vmem [resolvable:$true] %s108_s0 }
  0x2e   :  { %s3448_s5 = sld [smem:[#allocation54_spill]] }
  0x34   :  { %s2307_s24 = scalar_lea.hbm %s3448_s5, 512 }
  0x35   :  { %p2308_p8 = scmp.ne.s32.totalorder %s3448_s5, %s2307_s24  ;;  %p2311_p9 = scmp.lt.u32.totalorder %s2307_s24, %s3448_s5 }
  0x37   :  { %p2313_p10 = pnand %p2311_p9, %p2308_p8 }
  0x39   :  { %2316 = shalt.err (!%p2313_p10)
}
  0x3a   :  { %s2317_s30 = scalar_lea.vmem %s85_s29, 512  ;;  %p2322_p12 = scmp.lt.s32.totalorder %s85_s29, %s85_s29 }
  0x3b   :  { %p2318_p11 = scmp.ne.s32.totalorder %s85_s29, %s2317_s30  ;;  %p2323_p13 = scmp.lt.s32.totalorder %s2317_s30, %s2317_s30 }
  0x3d   :  { %p2324_p0 = por %p2323_p13, %p2322_p12 }
  0x3f   :  { %p2325_p1 = pnand %p2324_p0, %p2318_p11 }
  0x41   :  { %2328 = shalt.err (!%p2325_p1)
}
  0x42   :  { %90 = dma.hbm_to_vmem [thread:$0]  %s3448_s5, 512, %s85_s29, [#allocation10], %s2796_s26, %s2796_s26, %s2797_s2  }
  0x43   :  { %s3449_s22 = sld [smem:[#allocation56_spill]] }
  0x49   :  { %s2329_s28 = scalar_lea.hbm %s3449_s22, 128 }
  0x4a   :  { %p2330_p2 = scmp.ne.s32.totalorder %s3449_s22, %s2329_s28  ;;  %p2333_p3 = scmp.lt.u32.totalorder %s2329_s28, %s3449_s22 }
  0x4c   :  { %p2335_p4 = pnand %p2333_p3, %p2330_p2 }
  0x4e   :  { %2338 = shalt.err (!%p2335_p4)
}
  0x4f   :  { %s2339_s6 = scalar_lea.vmem %s109_s0, 128  ;;  %p2344_p6 = scmp.lt.s32.totalorder %s109_s0, %s109_s0 }
  0x50   :  { %p2340_p5 = scmp.ne.s32.totalorder %s109_s0, %s2339_s6  ;;  %p2345_p7 = scmp.lt.s32.totalorder %s2339_s6, %s2339_s6 }
  0x52   :  { %p2346_p8 = por %p2345_p7, %p2344_p6 }
  0x54   :  { %p2347_p9 = pnand %p2346_p8, %p2340_p5 }
  0x56   :  { %2350 = shalt.err (!%p2347_p9)
}
  0x57   :  { %114 = dma.hbm_to_vmem [thread:$0]  %s3449_s22, 128, %s109_s0, [#allocation13], %s2796_s26, %s2796_s26, %s2797_s2  }
  0x58   :  { %s2800_s25 = smov [#allocation15]   ;;  %s2801_s10 = smov [#allocation18]  }
  0x59   :  { %s133_s30 = sshll.u32 %s2800_s25, 4  ;;  %s153_s27 = sshll.u32 %s2801_s10, 4  ;;  %s134_s30 = int_to_ptr.vmem [resolvable:$true] %s133_s30  ;;  %s154_s27 = int_to_ptr.vmem [resolvable:$true] %s153_s27 }
  0x5a   :  { %s2351_s28 = scalar_lea.hbm %s3413_s7, 64 }
  0x5b   :  { %p2352_p10 = scmp.ne.s32.totalorder %s3413_s7, %s2351_s28  ;;  %p2355_p11 = scmp.lt.u32.totalorder %s2351_s28, %s3413_s7 }
  0x5d   :  { %p2357_p12 = pnand %p2355_p11, %p2352_p10 }
  0x5f   :  { %2360 = shalt.err (!%p2357_p12)
}
  0x60   :  { %s2361_s0 = scalar_lea.vmem %s134_s30, 64  ;;  %p2366_p0 = scmp.lt.s32.totalorder %s134_s30, %s134_s30 }
  0x61   :  { %p2362_p13 = scmp.ne.s32.totalorder %s134_s30, %s2361_s0  ;;  %p2367_p1 = scmp.lt.s32.totalorder %s2361_s0, %s2361_s0 }
  0x63   :  { %p2368_p2 = por %p2367_p1, %p2366_p0 }
  0x65   :  { %p2369_p3 = pnand %p2368_p2, %p2362_p13 }
  0x67   :  { %2372 = shalt.err (!%p2369_p3)
}
  0x68   :  { %136 = dma.hbm_to_vmem [thread:$0]  %s3413_s7, 64, %s134_s30, [#allocation16]  }
  0x69   :  { %s2373_s25 = scalar_lea.hbm %s3415_s9, 16 }
  0x6a   :  { %p2374_p4 = scmp.ne.s32.totalorder %s3415_s9, %s2373_s25  ;;  %p2377_p5 = scmp.lt.u32.totalorder %s2373_s25, %s3415_s9 }
  0x6c   :  { %p2379_p6 = pnand %p2377_p5, %p2374_p4 }
  0x6e   :  { %2382 = shalt.err (!%p2379_p6)
}
  0x6f   :  { %s2383_s4 = scalar_lea.vmem %s154_s27, 16  ;;  %s2387_s23 = scalar_lea.vmem %s154_s27, 32 }
  0x70   :  { %p2384_p7 = scmp.ne.s32.totalorder %s154_s27, %s2383_s4  ;;  %p2388_p8 = scmp.lt.s32.totalorder %s154_s27, %s154_s27 }
  0x71   :  { %p2389_p9 = scmp.lt.s32.totalorder %s2387_s23, %s2383_s4 }
  0x73   :  { %p2390_p10 = por %p2389_p9, %p2388_p8 }
  0x75   :  { %p2391_p11 = pnand %p2390_p10, %p2384_p7 }
  0x77   :  { %2394 = shalt.err (!%p2391_p11)
}
  0x78   :  { %156 = dma.hbm_to_vmem [thread:$0]  %s3415_s9, 16, %s154_s27, [#allocation19]  }
  0x79   :  { %s2802_s1 = smov [#allocation21]   ;;  %s2395_s6 = scalar_lea.hbm %s3418_s12, 64 }
  0x7a   :  { %s175_s24 = sshll.u32 %s2802_s1, 4  ;;  %p2396_p12 = scmp.ne.s32.totalorder %s3418_s12, %s2395_s6  ;;  %s176_s24 = int_to_ptr.vmem [resolvable:$true] %s175_s24 }
  0x7b   :  { %p2399_p13 = scmp.lt.u32.totalorder %s2395_s6, %s3418_s12 }
  0x7d   :  { %p2401_p0 = pnand %p2399_p13, %p2396_p12 }
  0x7f   :  { %2404 = shalt.err (!%p2401_p0)
}
  0x80   :  { %s2405_s3 = scalar_lea.vmem %s176_s24, 64  ;;  %p2410_p2 = scmp.lt.s32.totalorder %s176_s24, %s176_s24 }
  0x81   :  { %p2406_p1 = scmp.ne.s32.totalorder %s176_s24, %s2405_s3  ;;  %p2411_p3 = scmp.lt.s32.totalorder %s2405_s3, %s2405_s3 }
  0x83   :  { %p2412_p4 = por %p2411_p3, %p2410_p2 }
  0x85   :  { %p2413_p5 = pnand %p2412_p4, %p2406_p1 }
  0x87   :  { %2416 = shalt.err (!%p2413_p5)
}
  0x88   :  { %178 = dma.hbm_to_vmem [thread:$0]  %s3418_s12, 64, %s176_s24, [#allocation22]  }
  0x89   :  { %s2803_s21 = smov [#allocation24]   ;;  %s2804_s4 = smov [#allocation27]  }
  0x8a   :  { %s196_s28 = sshll.u32 %s2803_s21, 4  ;;  %s220_s23 = sshll.u32 %s2804_s4, 4  ;;  %s197_s28 = int_to_ptr.vmem [resolvable:$true] %s196_s28  ;;  %s3034_s23 = int_to_ptr.vmem [resolvable:$true] %s220_s23 }
  0x8b   :  { %s2417_s1 = scalar_lea.hbm %s3420_s14, 256 }
  0x8c   :  { %p2418_p6 = scmp.ne.s32.totalorder %s3420_s14, %s2417_s1  ;;  %p2421_p7 = scmp.lt.u32.totalorder %s2417_s1, %s3420_s14 }
  0x8e   :  { %p2423_p8 = pnand %p2421_p7, %p2418_p6 }
  0x90   :  { %2426 = shalt.err (!%p2423_p8)
}
  0x91   :  { %s2427_s12 = scalar_lea.vmem %s197_s28, 256  ;;  %p2432_p10 = scmp.lt.s32.totalorder %s197_s28, %s197_s28 }
  0x92   :  { %p2428_p9 = scmp.ne.s32.totalorder %s197_s28, %s2427_s12  ;;  %p2433_p11 = scmp.lt.s32.totalorder %s2427_s12, %s2427_s12 }
  0x94   :  { %p2434_p12 = por %p2433_p11, %p2432_p10 }
  0x96   :  { %p2435_p13 = pnand %p2434_p12, %p2428_p9 }
  0x98   :  { %2438 = shalt.err (!%p2435_p13)
}
  0x99   :  { %s2805_s24 = smov 128   ;;  %s2806_s5 = smov 8  }
  0x9a   :  { %202 = dma.hbm_to_vmem [thread:$0]  %s3420_s14, 256, %s197_s28, [#allocation25], %s2805_s24, %s2805_s24, %s2806_s5  }
  0x9b   :  { %s2439_s27 = scalar_lea.hbm %s3422_s16, 1024 }
  0x9c   :  { %p2440_p0 = scmp.ne.s32.totalorder %s3422_s16, %s2439_s27  ;;  %p2443_p1 = scmp.lt.u32.totalorder %s2439_s27, %s3422_s16 }
  0x9e   :  { %p2445_p2 = pnand %p2443_p1, %p2440_p0 }
  0xa0   :  { %2448 = shalt.err (!%p2445_p2)
}
  0xa1   :  { %s2449_s1 = scalar_lea.vmem %s3034_s23, 1024  ;;  %p2454_p4 = scmp.lt.s32.totalorder %s3034_s23, %s3034_s23 }
  0xa2   :  { %p2450_p3 = scmp.ne.s32.totalorder %s3034_s23, %s2449_s1  ;;  %p2455_p5 = scmp.lt.s32.totalorder %s2449_s1, %s2449_s1 }
  0xa4   :  { %p2456_p6 = por %p2455_p5, %p2454_p4 }
  0xa6   :  { %p2457_p7 = pnand %p2456_p6, %p2450_p3 }
  0xa8   :  { %2460 = shalt.err (!%p2457_p7)
}
  0xa9   :  { %226 = dma.hbm_to_vmem [thread:$0]  %s3422_s16, 1024, %s3034_s23, [#allocation28], %s2805_s24, %s2805_s24, %s2806_s5  }
  0xaa   :  { %s2807_s0 = smov [#allocation30]   ;;  %s2808_s6 = smov [#allocation3]  }
  0xab   :  { %s244_s22 = sshll.u32 %s2807_s0, 4  ;;  %s48_s29 = sshll.u32 %s2808_s6, 4  ;;  %s245_s22 = int_to_ptr.vmem [resolvable:$true] %s244_s22  ;;  %s3071_s29 = int_to_ptr.vmem [resolvable:$true] %s48_s29 }
  0xac   :  { %s2461_s10 = scalar_lea.hbm %s3424_s18, 2048 }
  0xad   :  { %p2462_p8 = scmp.ne.s32.totalorder %s3424_s18, %s2461_s10  ;;  %p2465_p9 = scmp.lt.u32.totalorder %s2461_s10, %s3424_s18 }
  0xaf   :  { %p2467_p10 = pnand %p2465_p9, %p2462_p8 }
  0xb1   :  { %2470 = shalt.err (!%p2467_p10)
}
  0xb2   :  { %s2471_s16 = scalar_lea.vmem %s245_s22, 2048  ;;  %p2476_p12 = scmp.lt.s32.totalorder %s245_s22, %s245_s22 }
  0xb3   :  { %p2472_p11 = scmp.ne.s32.totalorder %s245_s22, %s2471_s16  ;;  %p2477_p13 = scmp.lt.s32.totalorder %s2471_s16, %s2471_s16 }
  0xb5   :  { %p2478_p0 = por %p2477_p13, %p2476_p12 }
  0xb7   :  { %p2479_p1 = pnand %p2478_p0, %p2472_p11 }
  0xb9   :  { %2482 = shalt.err (!%p2479_p1)
}
  0xba   :  { %250 = dma.hbm_to_vmem [thread:$0]  %s3424_s18, 2048, %s245_s22, [#allocation31], %s2805_s24, %s2805_s24, %s2806_s5  }
  0xbb   :  { %s3450_s1 = sld [smem:[#allocation51_spill]] }
  0xc1   :  { %s2483_s14 = scalar_lea.hbm %s3450_s1, 2048 }
  0xc2   :  { %p2484_p2 = scmp.ne.s32.totalorder %s3450_s1, %s2483_s14  ;;  %p2487_p3 = scmp.lt.u32.totalorder %s2483_s14, %s3450_s1 }
  0xc4   :  { %p2489_p4 = pnand %p2487_p3, %p2484_p2 }
  0xc6   :  { %2492 = shalt.err (!%p2489_p4)
}
  0xc7   :  { %s2493_s25 = scalar_lea.vmem %s3071_s29, 2048  ;;  %p2498_p6 = scmp.lt.s32.totalorder %s3071_s29, %s3071_s29 }
  0xc8   :  { %p2494_p5 = scmp.ne.s32.totalorder %s3071_s29, %s2493_s25  ;;  %p2499_p7 = scmp.lt.s32.totalorder %s2493_s25, %s2493_s25 }
  0xca   :  { %p2500_p8 = por %p2499_p7, %p2498_p6 }
  0xcc   :  { %p2501_p9 = pnand %p2500_p8, %p2494_p5 }
  0xce   :  { %2504 = shalt.err (!%p2501_p9)
}
  0xcf   :  { %54 = dma.hbm_to_vmem [thread:$0]  %s3450_s1, 2048, %s3071_s29, [#allocation4], %s2805_s24, %s2805_s24, %s2806_s5  }
  0xd0   :  { %s2809_s10 = smov [#allocation8]   ;;  %s2810_s9 = smov [#allocation11]  }
  0xd1   :  { %s72_s3 = sshll.u32 %s2809_s10, 4  ;;  %s96_s27 = sshll.u32 %s2810_s9, 4  ;;  %s73_s3 = int_to_ptr.vmem [resolvable:$true] %s72_s3  ;;  %s3108_s27 = int_to_ptr.vmem [resolvable:$true] %s96_s27 }
  0xd2   :  { %s3451_s23 = sld [smem:[#allocation53_spill]] }
  0xd8   :  { %s2505_s4 = scalar_lea.hbm %s3451_s23, 2048 }
  0xd9   :  { %p2506_p10 = scmp.ne.s32.totalorder %s3451_s23, %s2505_s4  ;;  %p2509_p11 = scmp.lt.u32.totalorder %s2505_s4, %s3451_s23 }
  0xdb   :  { %p2511_p12 = pnand %p2509_p11, %p2506_p10 }
  0xdd   :  { %2514 = shalt.err (!%p2511_p12)
}
  0xde   :  { %s2515_s29 = scalar_lea.vmem %s73_s3, 2048  ;;  %p2520_p0 = scmp.lt.s32.totalorder %s73_s3, %s73_s3 }
  0xdf   :  { %p2516_p13 = scmp.ne.s32.totalorder %s73_s3, %s2515_s29  ;;  %p2521_p1 = scmp.lt.s32.totalorder %s2515_s29, %s2515_s29 }
  0xe1   :  { %p2522_p2 = por %p2521_p1, %p2520_p0 }
  0xe3   :  { %p2523_p3 = pnand %p2522_p2, %p2516_p13 }
  0xe5   :  { %2526 = shalt.err (!%p2523_p3)
}
  0xe6   :  { %78 = dma.hbm_to_vmem [thread:$0]  %s3451_s23, 2048, %s73_s3, [#allocation7], %s2805_s24, %s2805_s24, %s2806_s5  }
  0xe7   :  { %s3452_s25 = sld [smem:[#allocation55_spill]] }
  0xed   :  { %s2527_s18 = scalar_lea.hbm %s3452_s25, 1024 }
  0xee   :  { %p2528_p4 = scmp.ne.s32.totalorder %s3452_s25, %s2527_s18  ;;  %p2531_p5 = scmp.lt.u32.totalorder %s2527_s18, %s3452_s25 }
  0xf0   :  { %p2533_p6 = pnand %p2531_p5, %p2528_p4 }
  0xf2   :  { %2536 = shalt.err (!%p2533_p6)
}
  0xf3   :  { %s2537_s16 = scalar_lea.vmem %s3108_s27, 1024  ;;  %p2542_p8 = scmp.lt.s32.totalorder %s3108_s27, %s3108_s27 }
  0xf4   :  { %p2538_p7 = scmp.ne.s32.totalorder %s3108_s27, %s2537_s16  ;;  %p2543_p9 = scmp.lt.s32.totalorder %s2537_s16, %s2537_s16 }
  0xf6   :  { %p2544_p10 = por %p2543_p9, %p2542_p8 }
  0xf8   :  { %p2545_p11 = pnand %p2544_p10, %p2538_p7 }
  0xfa   :  { %2548 = shalt.err (!%p2545_p11)
}
  0xfb   :  { %102 = dma.hbm_to_vmem [thread:$0]  %s3452_s25, 1024, %s3108_s27, [#allocation10], %s2805_s24, %s2805_s24, %s2806_s5  }
  0xfc   :  { %s2811_s4 = smov [#allocation14]   ;;  %s2812_s30 = smov [#allocation17]  }
  0xfd   :  { %s120_s7 = sshll.u32 %s2811_s4, 4  ;;  %s143_s14 = sshll.u32 %s2812_s30, 4  ;;  %s121_s7 = int_to_ptr.vmem [resolvable:$true] %s120_s7  ;;  %s144_s14 = int_to_ptr.vmem [resolvable:$true] %s143_s14 }
  0xfe   :  { %s3453_s1 = sld [smem:[#allocation57_spill]] }
 0x104   :  { %s2549_s0 = scalar_lea.hbm %s3453_s1, 256 }
 0x105   :  { %p2550_p12 = scmp.ne.s32.totalorder %s3453_s1, %s2549_s0  ;;  %p2553_p13 = scmp.lt.u32.totalorder %s2549_s0, %s3453_s1 }
 0x107   :  { %p2555_p0 = pnand %p2553_p13, %p2550_p12 }
 0x109   :  { %2558 = shalt.err (!%p2555_p0)
}
 0x10a   :  { %s2559_s27 = scalar_lea.vmem %s121_s7, 256  ;;  %p2564_p2 = scmp.lt.s32.totalorder %s121_s7, %s121_s7 }
 0x10b   :  { %p2560_p1 = scmp.ne.s32.totalorder %s121_s7, %s2559_s27  ;;  %p2565_p3 = scmp.lt.s32.totalorder %s2559_s27, %s2559_s27 }
 0x10d   :  { %p2566_p4 = por %p2565_p3, %p2564_p2 }
 0x10f   :  { %p2567_p5 = pnand %p2566_p4, %p2560_p1 }
 0x111   :  { %2570 = shalt.err (!%p2567_p5)
}
 0x112   :  { %126 = dma.hbm_to_vmem [thread:$0]  %s3453_s1, 256, %s121_s7, [#allocation13], %s2805_s24, %s2805_s24, %s2806_s5  }
 0x113   :  { %s2571_s16 = scalar_lea.hbm %s3414_s8, 64 }
 0x114   :  { %p2572_p6 = scmp.ne.s32.totalorder %s3414_s8, %s2571_s16  ;;  %p2575_p7 = scmp.lt.u32.totalorder %s2571_s16, %s3414_s8 }
 0x116   :  { %p2577_p8 = pnand %p2575_p7, %p2572_p6 }
 0x118   :  { %2580 = shalt.err (!%p2577_p8)
}
 0x119   :  { %s2581_s28 = scalar_lea.vmem %s144_s14, 64  ;;  %p2586_p10 = scmp.lt.s32.totalorder %s144_s14, %s144_s14 }
 0x11a   :  { %p2582_p9 = scmp.ne.s32.totalorder %s144_s14, %s2581_s28  ;;  %p2587_p11 = scmp.lt.s32.totalorder %s2581_s28, %s2581_s28 }
 0x11c   :  { %p2588_p12 = por %p2587_p11, %p2586_p10 }
 0x11e   :  { %p2589_p13 = pnand %p2588_p12, %p2582_p9 }
 0x120   :  { %2592 = shalt.err (!%p2589_p13)
}
 0x121   :  { %146 = dma.hbm_to_vmem [thread:$0]  %s3414_s8, 64, %s144_s14, [#allocation16]  }
 0x122   :  { %s2813_s1 = smov [#allocation20]   ;;  %s2814_s6 = smov [#allocation23]  }
 0x123   :  { %s165_s0 = sshll.u32 %s2813_s1, 4  ;;  %s184_s12 = sshll.u32 %s2814_s6, 4  ;;  %s166_s0 = int_to_ptr.vmem [resolvable:$true] %s165_s0  ;;  %s3172_s12 = int_to_ptr.vmem [resolvable:$true] %s184_s12 }
 0x124   :  { %s2593_s27 = scalar_lea.hbm %s3417_s11, 64 }
 0x125   :  { %p2594_p0 = scmp.ne.s32.totalorder %s3417_s11, %s2593_s27  ;;  %p2597_p1 = scmp.lt.u32.totalorder %s2593_s27, %s3417_s11 }
 0x127   :  { %p2599_p2 = pnand %p2597_p1, %p2594_p0 }
 0x129   :  { %2602 = shalt.err (!%p2599_p2)
}
 0x12a   :  { %s2603_s8 = scalar_lea.vmem %s166_s0, 64  ;;  %p2608_p4 = scmp.lt.s32.totalorder %s166_s0, %s166_s0 }
 0x12b   :  { %p2604_p3 = scmp.ne.s32.totalorder %s166_s0, %s2603_s8  ;;  %p2609_p5 = scmp.lt.s32.totalorder %s2603_s8, %s2603_s8 }
 0x12d   :  { %p2610_p6 = por %p2609_p5, %p2608_p4 }
 0x12f   :  { %p2611_p7 = pnand %p2610_p6, %p2604_p3 }
 0x131   :  { %2614 = shalt.err (!%p2611_p7)
}
 0x132   :  { %168 = dma.hbm_to_vmem [thread:$0]  %s3417_s11, 64, %s166_s0, [#allocation19]  }
 0x133   :  { %s2615_s4 = scalar_lea.hbm %s3419_s13, 256 }
 0x134   :  { %p2616_p8 = scmp.ne.s32.totalorder %s3419_s13, %s2615_s4  ;;  %p2619_p9 = scmp.lt.u32.totalorder %s2615_s4, %s3419_s13 }
 0x136   :  { %p2621_p10 = pnand %p2619_p9, %p2616_p8 }
 0x138   :  { %2624 = shalt.err (!%p2621_p10)
}
 0x139   :  { %s2625_s1 = scalar_lea.vmem %s3172_s12, 256  ;;  %p2630_p12 = scmp.lt.s32.totalorder %s3172_s12, %s3172_s12 }
 0x13a   :  { %p2626_p11 = scmp.ne.s32.totalorder %s3172_s12, %s2625_s1  ;;  %p2631_p13 = scmp.lt.s32.totalorder %s2625_s1, %s2625_s1 }
 0x13c   :  { %p2632_p0 = por %p2631_p13, %p2630_p12 }
 0x13e   :  { %p2633_p1 = pnand %p2632_p0, %p2626_p11 }
 0x140   :  { %2636 = shalt.err (!%p2633_p1)
}
 0x141   :  { %190 = dma.hbm_to_vmem [thread:$0]  %s3419_s13, 256, %s3172_s12, [#allocation22], %s2805_s24, %s2805_s24, %s2806_s5  }
 0x142   :  { %s2815_s6 = smov [#allocation26]   ;;  %s2816_s22 = smov [#allocation29]  }
 0x143   :  { %s208_s18 = sshll.u32 %s2815_s6, 4  ;;  %s232_s27 = sshll.u32 %s2816_s22, 4  ;;  %s209_s18 = int_to_ptr.vmem [resolvable:$true] %s208_s18  ;;  %s3206_s27 = int_to_ptr.vmem [resolvable:$true] %s232_s27 }
 0x144   :  { %s2637_s9 = scalar_lea.hbm %s3421_s15, 512 }
 0x145   :  { %p2638_p2 = scmp.ne.s32.totalorder %s3421_s15, %s2637_s9  ;;  %p2641_p3 = scmp.lt.u32.totalorder %s2637_s9, %s3421_s15 }
 0x147   :  { %p2643_p4 = pnand %p2641_p3, %p2638_p2 }
 0x149   :  { %2646 = shalt.err (!%p2643_p4)
}
 0x14a   :  { %s2647_s13 = scalar_lea.vmem %s209_s18, 512  ;;  %p2652_p6 = scmp.lt.s32.totalorder %s209_s18, %s209_s18 }
 0x14b   :  { %p2648_p5 = scmp.ne.s32.totalorder %s209_s18, %s2647_s13  ;;  %p2653_p7 = scmp.lt.s32.totalorder %s2647_s13, %s2647_s13 }
 0x14d   :  { %p2654_p8 = por %p2653_p7, %p2652_p6 }
 0x14f   :  { %p2655_p9 = pnand %p2654_p8, %p2648_p5 }
 0x151   :  { %2658 = shalt.err (!%p2655_p9)
}
 0x152   :  { %214 = dma.hbm_to_vmem [thread:$0]  %s3421_s15, 512, %s209_s18, [#allocation25], %s2796_s26, %s2796_s26, %s2797_s2  }
 0x153   :  { %s2659_s30 = scalar_lea.hbm %s3423_s17, 1024 }
 0x154   :  { %p2660_p10 = scmp.ne.s32.totalorder %s3423_s17, %s2659_s30  ;;  %p2663_p11 = scmp.lt.u32.totalorder %s2659_s30, %s3423_s17 }
 0x156   :  { %p2665_p12 = pnand %p2663_p11, %p2660_p10 }
 0x158   :  { %2668 = shalt.err (!%p2665_p12)
}
 0x159   :  { %s2669_s11 = scalar_lea.vmem %s3206_s27, 1024  ;;  %p2674_p0 = scmp.lt.s32.totalorder %s3206_s27, %s3206_s27 }
 0x15a   :  { %p2670_p13 = scmp.ne.s32.totalorder %s3206_s27, %s2669_s11  ;;  %p2675_p1 = scmp.lt.s32.totalorder %s2669_s11, %s2669_s11 }
 0x15c   :  { %p2676_p2 = por %p2675_p1, %p2674_p0 }
 0x15e   :  { %p2677_p3 = pnand %p2676_p2, %p2670_p13 }
 0x160   :  { %2680 = shalt.err (!%p2677_p3)
}
 0x161   :  { %238 = dma.hbm_to_vmem [thread:$0]  %s3423_s17, 1024, %s3206_s27, [#allocation28], %s2796_s26, %s2796_s26, %s2797_s2  }
 0x162   :  { %s2817_s6 = smov [#allocation32]   ;;  %s2818_s22 = smov [#allocation33]  }
 0x163   :  { %s256_s18 = sshll.u32 %s2817_s6, 4  ;;  %s269_s25 = sshll.u32 %s2818_s22, 4  ;;  %s257_s18 = int_to_ptr.vmem [resolvable:$true] %s256_s18  ;;  %s270_s25 = int_to_ptr.vmem [resolvable:$true] %s269_s25 }
 0x164   :  { %s2681_s21 = scalar_lea.hbm %s3425_s19, 384 }
 0x165   :  { %p2682_p4 = scmp.ne.s32.totalorder %s3425_s19, %s2681_s21  ;;  %p2685_p5 = scmp.lt.u32.totalorder %s2681_s21, %s3425_s19 }
 0x167   :  { %p2687_p6 = pnand %p2685_p5, %p2682_p4 }
 0x169   :  { %2690 = shalt.err (!%p2687_p6)
}
 0x16a   :  { %s2691_s17 = scalar_lea.vmem %s257_s18, 384  ;;  %p2696_p8 = scmp.lt.s32.totalorder %s257_s18, %s257_s18 }
 0x16b   :  { %p2692_p7 = scmp.ne.s32.totalorder %s257_s18, %s2691_s17  ;;  %p2697_p9 = scmp.lt.s32.totalorder %s2691_s17, %s2691_s17 }
 0x16d   :  { %p2698_p10 = por %p2697_p9, %p2696_p8 }
 0x16f   :  { %p2699_p11 = pnand %p2698_p10, %p2692_p7 }
 0x171   :  { %2702 = shalt.err (!%p2699_p11)
}
 0x172   :  { %262 = dma.hbm_to_vmem [thread:$0]  %s3425_s19, 384, %s257_s18, [#allocation31], %s2796_s26, %s2796_s26, %s2797_s2  }
 0x173   :  { %s2703_s4 = scalar_lea.hbm %s3426_s20, 16 }
 0x174   :  { %p2704_p12 = scmp.ne.s32.totalorder %s3426_s20, %s2703_s4  ;;  %p2707_p13 = scmp.lt.u32.totalorder %s2703_s4, %s3426_s20 }
 0x176   :  { %p2709_p0 = pnand %p2707_p13, %p2704_p12 }
 0x178   :  { %2712 = shalt.err (!%p2709_p0)
}
 0x179   :  { %s2713_s1 = scalar_lea.vmem %s270_s25, 16  ;;  %s2717_s11 = scalar_lea.vmem %s270_s25, 32 }
 0x17a   :  { %p2714_p1 = scmp.ne.s32.totalorder %s270_s25, %s2713_s1  ;;  %p2718_p2 = scmp.lt.s32.totalorder %s270_s25, %s270_s25 }
 0x17b   :  { %p2719_p3 = scmp.lt.s32.totalorder %s2717_s11, %s2713_s1 }
 0x17d   :  { %p2720_p4 = por %p2719_p3, %p2718_p2 }
 0x17f   :  { %p2721_p5 = pnand %p2720_p4, %p2714_p1 }
 0x181   :  { %2724 = shalt.err (!%p2721_p5)
}
 0x182   :  { %272 = dma.hbm_to_vmem [thread:$0]  %s3426_s20, 16, %s270_s25, [#allocation34]  }
 0x183   :  { %2769 = dma.done.wait [#allocation4], 2048  }
 0x184   :  { %2770 = vsyncadd [#allocation4], 4294965248 }
 0x185   :  { %2771 = dma.done.wait [#allocation7], 3072  }
 0x186   :  { %2772 = vsyncadd [#allocation7], 4294964224 }
 0x187   :  { %2773 = dma.done.wait [#allocation10], 1536  }
 0x188   :  { %2774 = vsyncadd [#allocation10], 4294965760 }
 0x189   :  { %2775 = dma.done.wait [#allocation13], 384  }
 0x18a   :  { %2776 = vsyncadd [#allocation13], 4294966912 }
 0x18b   :  { %2777 = dma.done.wait [#allocation16], 128  }
 0x18c   :  { %2778 = vsyncadd [#allocation16], 4294967168 }
 0x18d   :  { %2779 = dma.done.wait [#allocation19], 80  }
 0x18e   :  { %2780 = vsyncadd [#allocation19], 4294967216 }
 0x18f   :  { %2781 = dma.done.wait [#allocation22], 320  }
 0x190   :  { %2782 = vsyncadd [#allocation22], 4294966976 }
 0x191   :  { %2783 = dma.done.wait [#allocation25], 768  }
 0x192   :  { %2784 = vsyncadd [#allocation25], 4294966528 }
 0x193   :  { %2785 = dma.done.wait [#allocation28], 2048  }
 0x194   :  { %2786 = vsyncadd [#allocation28], 4294965248 }
 0x195   :  { %2787 = dma.done.wait [#allocation31], 2432  }
 0x196   :  { %2788 = vsyncadd [#allocation31], 4294964864 }
 0x197   :  { %2789 = dma.done.wait [#allocation34], 16  }
 0x198   :  { %2790 = vsyncadd [#allocation34], 4294967280  ;;  %v2819_v1 = vmov 0   ;;  %v350_v2 = vld [vmem:[#allocation3] sm:$0xff]  ;;  %v351_v3 = vld [vmem:[#allocation3 + $0x8] sm:$0xff]  ;;  %vm510_vm0 = vcmask 334848  }
 0x199   :  { %2125 = vset.pattern.permute.xlu0 %v2819_v1  ;;  %2126 = vset.pattern.permute.xlu1 %v2819_v1  ;;  %v352_v4 = vld [vmem:[#allocation3 + $0x10] sm:$0xff]  ;;  %v366_v5 = vpack.c.bf16 %v351_v3, %v350_v2  ;;  %v353_v6 = vld [vmem:[#allocation3 + $0x18] sm:$0xff]  ;;  %v354_v9 = vld [vmem:[#allocation3 + $0x20] sm:$0xff]  ;;  %vm2821_vm1 = vmmov 0   ;;  %vm856_vm2 = vcmask 523264   ;;  %vm1243_vm3 = vcmask 97280  }
 0x19a   :  { %v367_v7 = vpack.c.bf16 %v353_v6, %v352_v4  ;;  %v355_v10 = vld [vmem:[#allocation3 + $0x28] sm:$0xff]  ;;  %v2149_v11 = vld [vmem:[#allocation6] sm:$0xff]   ;;  %v356_v15 = vld [vmem:[#allocation3 + $0x30] sm:$0xff]  ;;  %vm1256_vm4 = vcmask 1045504   ;;  %s2833_s20 = smov [#allocation35]  }
 0x19b   :  { %2076 = vmatprep.subr.msk.bf16.mxu0 %vm510_vm0, %v366_v5  ;;  %v536_v8 = vsel %vm510_vm0, %v366_v5, 0  ;;  %1962 = vmatprep.mubr.msk.bf16.mxu0 %vm510_vm0, %v2149_v11  ;;  %v368_v13 = vpack.c.bf16 %v355_v10, %v354_v9  ;;  %v374_v14 = vld [vmem:[#allocation8] sm:$0xff]  ;;  %v357_v16 = vld [vmem:[#allocation3 + $0x38] sm:$0xff]  ;;  %v376_v17 = vld [vmem:[#allocation8 + $0x10] sm:$0xff]  ;;  %s1800_s2 = sshll.u32 %s2833_s20, 4  ;;  %s1801_s2 = int_to_ptr.vmem [resolvable:$true] %s1800_s2 }
 0x19c   :  { %1947 = vmatpush3.bf16.xpose.msra.mxu0 %v536_v8  ;;  %v539_v12 = vsel %vm510_vm0, %v367_v7, 0  ;;  %392 = vperm.xlu0 %2125, %v374_v14   ;;  %v358_v18 = vld [vmem:[#allocation3 + $0x40] sm:$0xff]  ;;  %v359_v19 = vld [vmem:[#allocation3 + $0x48] sm:$0xff]  ;;  %v377_v21 = vld [vmem:[#allocation8 + $0x18] sm:$0xff]  ;;  %v369_v23 = vpack.c.bf16 %v357_v16, %v356_v15  ;;  %s2725_s15 = scalar_lea.vmem %s1801_s2, 16  ;;  %s2729_s0 = scalar_lea.vmem %s1801_s2, 32 }
 0x19d   :  { %2077 = vmatprep.subr.msk.bf16.mxu0 %vm510_vm0, %v367_v7  ;;  %v375_v20 = vld [vmem:[#allocation8 + $0x8] sm:$0xff]  ;;  %402 = vperm.xlu1 %2126, %v376_v17   ;;  %v542_v22 = vsel %vm510_vm0, %v368_v13, 0  ;;  %v370_v24 = vpack.c.bf16 %v359_v19, %v358_v18  ;;  %v378_v25 = vld [vmem:[#allocation8 + $0x20] sm:$0xff]  ;;  %v380_v28 = vld [vmem:[#allocation8 + $0x30] sm:$0xff]  ;;  %p2726_p6 = scmp.ne.s32.totalorder %s1801_s2, %s2725_s15  ;;  %p2730_p7 = scmp.lt.s32.totalorder %s1801_s2, %s1801_s2 }
 0x19e   :  { %v379_v26 = vld [vmem:[#allocation8 + $0x28] sm:$0xff]  ;;  %v545_v27 = vsel %vm510_vm0, %v369_v23, 0  ;;  %v381_v30 = vld [vmem:[#allocation8 + $0x38] sm:$0xff]  ;;  %v382_v31 = vld [vmem:[#allocation8 + $0x40] sm:$0xff]  ;;  %p2731_p8 = scmp.lt.s32.totalorder %s2729_s0, %s2725_s15 }
 0x19f   :  { %v548_v29 = vsel %vm510_vm0, %v370_v24, 0  ;;  %v383_v32 = vld [vmem:[#allocation8 + $0x48] sm:$0xff]  ;;  %v360_v33 = vld [vmem:[#allocation3 + $0x50] sm:$0xff]  ;;  %v361_v34 = vld [vmem:[#allocation3 + $0x58] sm:$0xff] }
 0x1a0   :  { %397 = vperm.xlu0 %2125, %v375_v20   ;;  %v384_v35 = vld [vmem:[#allocation8 + $0x50] sm:$0xff]  ;;  %v385_v36 = vld [vmem:[#allocation8 + $0x58] sm:$0xff]  ;;  %v371_v37 = vpack.c.bf16 %v361_v34, %v360_v33  ;;  %v386_v38 = vld [vmem:[#allocation8 + $0x60] sm:$0xff]  ;;  %p2732_p9 = por %p2731_p8, %p2730_p7 }
 0x1a1   :  { %407 = vperm.xlu1 %2126, %v377_v21   ;;  %v387_v39 = vld [vmem:[#allocation8 + $0x68] sm:$0xff]  ;;  %v362_v40 = vld [vmem:[#allocation3 + $0x60] sm:$0xff]  ;;  %v388_v42 = vld [vmem:[#allocation8 + $0x70] sm:$0xff] }
 0x1a2   :  { %v363_v41 = vld [vmem:[#allocation3 + $0x68] sm:$0xff]  ;;  %v389_v43 = vld [vmem:[#allocation8 + $0x78] sm:$0xff]  ;;  %v551_v44 = vsel %vm510_vm0, %v371_v37, 0  ;;  %v688_v46 = vld [vmem:[#allocation11] sm:$0xff]  ;;  %p2733_p10 = pnand %p2732_p9, %p2726_p6 }
 0x1a3   :  { %v372_v45 = vpack.c.bf16 %v363_v41, %v362_v40  ;;  %v689_v47 = vld [vmem:[#allocation11 + $0x8] sm:$0xff]  ;;  %v364_v48 = vld [vmem:[#allocation3 + $0x70] sm:$0xff]  ;;  %v365_v49 = vld [vmem:[#allocation3 + $0x78] sm:$0xff] }
 0x1a4   :  { %1949 = vmatpush3.bf16.xpose.msra.mxu0 %v539_v12  ;;  %412 = vperm.xlu0 %2125, %v378_v25   ;;  %v690_v50 = vld [vmem:[#allocation11 + $0x10] sm:$0xff]  ;;  %v691_v51 = vld [vmem:[#allocation11 + $0x18] sm:$0xff]  ;;  %v373_v53 = vpack.c.bf16 %v365_v49, %v364_v48  ;;  %v692_v54 = vld [vmem:[#allocation11 + $0x20] sm:$0xff] }
 0x1a5   :  { %2078 = vmatprep.subr.msk.bf16.mxu0 %vm510_vm0, %v368_v13  ;;  %417 = vperm.xlu1 %2126, %v379_v26   ;;  %v554_v52 = vsel %vm510_vm0, %v372_v45, 0  ;;  %v693_v55 = vld [vmem:[#allocation11 + $0x28] sm:$0xff]  ;;  %v694_v56 = vld [vmem:[#allocation11 + $0x30] sm:$0xff]  ;;  %v695_v57 = vld [vmem:[#allocation11 + $0x38] sm:$0xff] }
 0x1a6   :  { %v557_v58 = vsel %vm510_vm0, %v373_v53, 0  ;;  %v839_v59 = vld [vmem:[#allocation14] sm:$0xff]  ;;  %v840_v60 = vld [vmem:[#allocation14 + $0x8] sm:$0xf]  ;;  %v3289_v62 = vld [vmem:[#allocation15] sm:$0x7] }
 0x1a7   :  { %v2150_v61 = vld [vmem:[#allocation6 + $0x8] sm:$0xff]   ;;  %v2151_v63 = vld [vmem:[#allocation6 + $0x10] sm:$0xff]   ;;  %v2152_v0 = vld [vmem:[#allocation6 + $0x18] sm:$0xff]  }
 0x1a8   :  { %422 = vperm.xlu0 %2125, %v380_v28   ;;  %v2153_v2 = vld [vmem:[#allocation6 + $0x20] sm:$0xff]   ;;  %v2154_v3 = vld [vmem:[#allocation6 + $0x28] sm:$0xff]   ;;  %v2155_v4 = vld [vmem:[#allocation6 + $0x30] sm:$0xff]  }
 0x1a9   :  { %427 = vperm.xlu1 %2126, %v381_v30   ;;  %v2156_v5 = vld [vmem:[#allocation6 + $0x38] sm:$0xff]   ;;  %v2157_v6 = vld [vmem:[#allocation9] sm:$0xff]  }
 0x1aa   :  { %1994 = vmatprep.mubr.bf16.mxu1 %v2157_v6 }
 0x1ac   :  { %1951 = vmatpush3.bf16.xpose.msra.mxu0 %v542_v22  ;;  %432 = vperm.xlu0 %2125, %v382_v31  }
 0x1ad   :  { %2079 = vmatprep.subr.msk.bf16.mxu0 %vm510_vm0, %v369_v23  ;;  %437 = vperm.xlu1 %2126, %v383_v32  }
 0x1b0   :  { %442 = vperm.xlu0 %2125, %v384_v35  }
 0x1b1   :  { %447 = vperm.xlu1 %2126, %v385_v36  }
 0x1b4   :  { %1953 = vmatpush3.bf16.xpose.msra.mxu0 %v545_v27  ;;  %452 = vperm.xlu0 %2125, %v386_v38  }
 0x1b5   :  { %2080 = vmatprep.subr.msk.bf16.mxu0 %vm510_vm0, %v370_v24  ;;  %457 = vperm.xlu1 %2126, %v387_v39  }
 0x1b8   :  { %462 = vperm.xlu0 %2125, %v388_v42  }
 0x1b9   :  { %467 = vperm.xlu1 %2126, %v389_v43  }
 0x1bc   :  { %1955 = vmatpush3.bf16.xpose.msra.mxu0 %v548_v29  ;;  %698 = vperm.xlu0 %2125, %v688_v46  }
 0x1bd   :  { %2081 = vmatprep.subr.msk.bf16.mxu0 %vm510_vm0, %v371_v37  ;;  %703 = vperm.xlu1 %2126, %v689_v47  }
 0x1c0   :  { %708 = vperm.xlu0 %2125, %v690_v50  }
 0x1c1   :  { %713 = vperm.xlu1 %2126, %v691_v51  }
 0x1c4   :  { %1957 = vmatpush3.bf16.xpose.msra.mxu0 %v551_v44  ;;  %718 = vperm.xlu0 %2125, %v692_v54  }
 0x1c5   :  { %2082 = vmatprep.subr.msk.bf16.mxu0 %vm510_vm0, %v372_v45  ;;  %723 = vperm.xlu1 %2126, %v693_v55  }
 0x1c8   :  { %728 = vperm.xlu0 %2125, %v694_v56  }
 0x1c9   :  { %733 = vperm.xlu1 %2126, %v695_v57  }
 0x1cc   :  { %1959 = vmatpush3.bf16.xpose.msra.mxu0 %v554_v52  ;;  %843 = vperm.xlu0 %2125, %v839_v59  }
 0x1cd   :  { %2083 = vmatprep.subr.msk.bf16.mxu0 %vm510_vm0, %v373_v53  ;;  %848 = vperm.xlu1 %2126, %v840_v60  }
 0x1d0   :  { %907 = vperm.xlu0 %2125, %v3289_v62  }
 0x1d4   :  { %1961 = vmatpush3.bf16.xpose.msra.mxu0 %v557_v58 }
 0x1db   :  { %1963 = vmatmul.mubr.msk.bf16.vlgmr.msra.gmra.mrb[0].mxu0 %vm510_vm0, %v2150_v61 }
 0x1dc   :  { %1966 = vmatprep.mubr.msk.bf16.mxu0 %vm510_vm0, %v2151_v63 }
 0x1e3   :  { %1967 = vmatmul.mubr.msk.bf16.gmra.mrb[4].mxu0 %vm510_vm0, %v2152_v0 }
 0x1e4   :  { %1970 = vmatprep.mubr.msk.bf16.mxu0 %vm510_vm0, %v2153_v2 }
 0x1eb   :  { %1971 = vmatmul.mubr.msk.bf16.gmra.mrb[8].mxu0 %vm510_vm0, %v2154_v3 }
 0x1ec   :  { %1974 = vmatprep.mubr.msk.bf16.mxu0 %vm510_vm0, %v2155_v4 }
 0x1f3   :  { %1975 = vmatmul.mubr.msk.bf16.gmra.mrb[12].mxu0 %vm510_vm0, %v2156_v5 }
 0x21b   :  { %v393_v7 = vpop.permute.xlu0 %392 }
 0x21c   :  { %v403_v8 = vpop.permute.xlu1 %402 }
 0x21f   :  { %v398_v9 = vpop.permute.xlu0 %397 }
 0x220   :  { %v408_v10 = vpop.permute.xlu1 %407 }
 0x223   :  { %v413_v11 = vpop.permute.xlu0 %412 }
 0x224   :  { %v418_v12 = vpop.permute.xlu1 %417 }
 0x227   :  { %v423_v13 = vpop.permute.xlu0 %422 }
 0x228   :  { %v428_v17 = vpop.permute.xlu1 %427 }
 0x22b   :  { %v433_v23 = vpop.permute.xlu0 %432 }
 0x22c   :  { %v438_v24 = vpop.permute.xlu1 %437 }
 0x22f   :  { %v443_v32 = vpop.permute.xlu0 %442 }
 0x230   :  { %v448_v36 = vpop.permute.xlu1 %447 }
 0x233   :  { %v453_v44 = vpop.permute.xlu0 %452 }
 0x234   :  { %v458_v49 = vpop.permute.xlu1 %457 }
 0x237   :  { %v463_v55 = vpop.permute.xlu0 %462 }
 0x238   :  { %v468_v61 = vpop.permute.xlu1 %467 }
 0x2ae   :  { %v1964_v14 = vpop.f32.mrb[0].mxu0 }
 0x2af   :  { %v602_v15 = vadd.f32 %v1964_v14, %v403_v8  ;;  %v593_v16 = vpop.f32.mrb[1].mxu0 }
 0x2b0   :  { %v594_v18 = vadd.f32 %v593_v16, %v393_v7  ;;  %v1965_v19 = vpop.f32.mrb[2].mxu0 }
 0x2b1   :  { %2177 = vtanh.f32 %v602_v15  ;;  %v605_v20 = vadd.f32 %v1965_v19, %v408_v10  ;;  %v596_v21 = vpop.f32.mrb[3].mxu0  ;;  %v2160_v19 = vld [vmem:[#allocation9 + $0x18] sm:$0xff]  }
 0x2b2   :  { %2179 = vtanh.f32 %v594_v18  ;;  %v597_v22 = vadd.f32 %v596_v21, %v398_v9  ;;  %v2159_v18 = vld [vmem:[#allocation9 + $0x10] sm:$0xff]   ;;  %v2822_v21 = vmov 1  }
 0x2b3   :  { %2181 = vtanh.f32 %v605_v20  ;;  %v2820_v20 = vmov 0.0   ;;  %2127 = vset.pattern.permute.xlu1 %v2822_v21 }
 0x2b4   :  { %2183 = vtanh.f32 %v597_v22  ;;  %916 = vperm.xlu1 %2127, %v3289_v62   ;;  %v2823_v22 = vmov 2  }
 0x2b5   :  { %2128 = vset.pattern.permute.xlu0 %v2823_v22 }
 0x2b6   :  { %v1968_v25 = vpop.f32.mrb[4].mxu0  ;;  %926 = vperm.xlu0 %2128, %v3289_v62  }
 0x2b7   :  { %v618_v26 = vadd.f32 %v1968_v25, %v423_v13  ;;  %v609_v27 = vpop.f32.mrb[5].mxu0  ;;  %v2826_v25 = vmov 4  }
 0x2b8   :  { %v610_v28 = vadd.f32 %v609_v27, %v413_v11  ;;  %v1969_v29 = vpop.f32.mrb[6].mxu0  ;;  %v2828_v27 = vmov 6  }
 0x2b9   :  { %2185 = vtanh.f32 %v618_v26  ;;  %v621_v30 = vadd.f32 %v1969_v29, %v428_v17  ;;  %v612_v31 = vpop.f32.mrb[7].mxu0  ;;  %v2158_v17 = vld [vmem:[#allocation9 + $0x8] sm:$0xff]   ;;  %v2827_v26 = vmov 8   ;;  %v2830_v29 = vmov 7  }
 0x2ba   :  { %2187 = vtanh.f32 %v610_v28  ;;  %v613_v33 = vadd.f32 %v612_v31, %v418_v12  ;;  %v2829_v28 = vmov 11   ;;  %v1081_v31 = vld [vmem:[#allocation20] sm:$0x7] }
 0x2bb   :  { %v2178_v34 = vpop.eup %2177  ;;  %2189 = vtanh.f32 %v621_v30  ;;  %v1032_v30 = vld [vmem:[#allocation18] sm:$0x1] }
 0x2bc   :  { %v2180_v35 = vpop.eup %2179  ;;  %2191 = vtanh.f32 %v613_v33  ;;  %v1100_v33 = vld [vmem:[#allocation23] sm:$0xff] }
 0x2bd   :  { %v2182_v37 = vpop.eup %2181 }
 0x2be   :  { %v2184_v38 = vpop.eup %2183  ;;  %v1972_v39 = vpop.f32.mrb[8].mxu0  ;;  %v681_v40 = vpack.c.bf16 %v2182_v37, %v2178_v34  ;;  %v2832_v34 = vmov 10   ;;  %v1033_v37 = vld [vmem:[#allocation2] sm:$0x1] }
 0x2bf   :  { %v634_v41 = vadd.f32 %v1972_v39, %v443_v32  ;;  %v625_v42 = vpop.f32.mrb[9].mxu0  ;;  %v680_v43 = vpack.c.bf16 %v2184_v38, %v2180_v35  ;;  %v2831_v32 = vmov 9   ;;  %v904_v35 = vld [vmem:[#allocation17] sm:$0x7]  ;;  %v1103_v39 = vld [vmem:[#allocation24 + $0x8] sm:$0xf] }
 0x2c0   :  { %v626_v45 = vadd.f32 %v625_v42, %v433_v23  ;;  %v1973_v46 = vpop.f32.mrb[10].mxu0  ;;  %v2824_v23 = vmov 3   ;;  %v1102_v38 = vld [vmem:[#allocation24] sm:$0xff] }
 0x2c1   :  { %2193 = vtanh.f32 %v634_v41  ;;  %v637_v47 = vadd.f32 %v1973_v46, %v448_v36  ;;  %v628_v48 = vpop.f32.mrb[11].mxu0  ;;  %1978 = vmatprep.subr.bf16.mxu1 %v680_v43  ;;  %2129 = vset.pattern.permute.xlu1 %v2824_v23  ;;  %v1101_v36 = vld [vmem:[#allocation23 + $0x8] sm:$0xf]  ;;  %v699_v41 = vpop.permute.xlu0 %698  ;;  %v1177_v42 = vld [vmem:[#allocation27 + $0x10] sm:$0xff] }
 0x2c2   :  { %2195 = vtanh.f32 %v626_v45  ;;  %v629_v50 = vadd.f32 %v628_v48, %v438_v24  ;;  %1979 = vmatpush3.bf16.msra.mxu1 %v680_v43  ;;  %936 = vperm.xlu1 %2129, %v3289_v62   ;;  %v2825_v24 = vmov 5   ;;  %v704_v43 = vpop.permute.xlu1 %703 }
 0x2c3   :  { %v2186_v51 = vpop.eup %2185  ;;  %2197 = vtanh.f32 %v637_v47  ;;  %1980 = vmatprep.subr.bf16.mxu1 %v681_v40  ;;  %2131 = vset.pattern.permute.xlu0 %v2825_v24  ;;  %v1181_v47 = vld [vmem:[#allocation27 + $0x30] sm:$0xff]  ;;  %v1365_v24 = vld [vmem:[#allocation30 + $0x60] sm:$0xff] }
 0x2c4   :  { %v2188_v52 = vpop.eup %2187  ;;  %2199 = vtanh.f32 %v629_v50  ;;  %956 = vperm.xlu0 %2131, %v3289_v62  }
 0x2c5   :  { %v2190_v53 = vpop.eup %2189  ;;  %v709_v45 = vpop.permute.xlu0 %708 }
 0x2c6   :  { %v2192_v54 = vpop.eup %2191  ;;  %v1976_v56 = vpop.f32.mrb[12].mxu0  ;;  %1981 = vmatpush3.bf16.msra.mxu1 %v681_v40  ;;  %v683_v57 = vpack.c.bf16 %v2190_v53, %v2186_v51  ;;  %2130 = vset.pattern.permute.xlu1 %v2826_v25  ;;  %v1176_v40 = vld [vmem:[#allocation27 + $0x8] sm:$0xff]  ;;  %v1353_v53 = vld [vmem:[#allocation30] sm:$0xff]  ;;  %v2161_v25 = vld [vmem:[#allocation12] sm:$0x3f]  }
 0x2c7   :  { %v650_v58 = vadd.f32 %v1976_v56, %v463_v55  ;;  %v641_v59 = vpop.f32.mrb[13].mxu0  ;;  %v682_v60 = vpack.c.bf16 %v2192_v54, %v2188_v52  ;;  %946 = vperm.xlu1 %2130, %v3289_v62   ;;  %v714_v46 = vpop.permute.xlu1 %713 }
 0x2c8   :  { %v642_v63 = vadd.f32 %v641_v59, %v453_v44  ;;  %v1977_v0 = vpop.f32.mrb[14].mxu0  ;;  %2134 = vset.pattern.permute.xlu0 %v2827_v26  ;;  %v1179_v44 = vld [vmem:[#allocation27 + $0x20] sm:$0xff]  ;;  %v1367_v26 = vld [vmem:[#allocation30 + $0x70] sm:$0xff] }
 0x2c9   :  { %2201 = vtanh.f32 %v650_v58  ;;  %v653_v2 = vadd.f32 %v1977_v0, %v468_v61  ;;  %v644_v3 = vpop.f32.mrb[15].mxu0  ;;  %1982 = vmatprep.subr.bf16.mxu1 %v682_v60  ;;  %986 = vperm.xlu0 %2134, %v3289_v62   ;;  %v719_v51 = vpop.permute.xlu0 %718  ;;  %v1355_v58 = vld [vmem:[#allocation30 + $0x10] sm:$0xff] }
 0x2ca   :  { %2203 = vtanh.f32 %v642_v63  ;;  %v645_v4 = vadd.f32 %v644_v3, %v458_v49  ;;  %1983 = vmatpush3.bf16.msra.mxu1 %v682_v60 }
 0x2cb   :  { %v2194_v5 = vpop.eup %2193  ;;  %2205 = vtanh.f32 %v653_v2  ;;  %1984 = vmatprep.subr.bf16.mxu1 %v683_v57  ;;  %2132 = vset.pattern.permute.xlu1 %v2828_v27  ;;  %v724_v56 = vpop.permute.xlu1 %723  ;;  %v2162_v27 = vld [vmem:[#allocation26] sm:$0xff]  }
 0x2cc   :  { %v2196_v6 = vpop.eup %2195  ;;  %2207 = vtanh.f32 %v645_v4  ;;  %966 = vperm.xlu1 %2132, %v3289_v62   ;;  %v1357_v4 = vld [vmem:[#allocation30 + $0x20] sm:$0xff] }
 0x2cd   :  { %v2198_v7 = vpop.eup %2197  ;;  %2137 = vset.pattern.permute.xlu0 %v2829_v28  ;;  %v729_v59 = vpop.permute.xlu0 %728 }
 0x2ce   :  { %v2200_v8 = vpop.eup %2199  ;;  %1985 = vmatpush3.bf16.msra.mxu1 %v683_v57  ;;  %v685_v9 = vpack.c.bf16 %v2198_v7, %v2194_v5  ;;  %1016 = vperm.xlu0 %2137, %v3289_v62  }
 0x2cf   :  { %v684_v10 = vpack.c.bf16 %v2200_v8, %v2196_v6  ;;  %v734_v0 = vpop.permute.xlu1 %733 }
 0x2d0   :  { %2133 = vset.pattern.permute.xlu1 %v2830_v29  ;;  %v1175_v29 = vld [vmem:[#allocation27] sm:$0xff] }
 0x2d1   :  { %1986 = vmatprep.subr.bf16.mxu1 %v684_v10  ;;  %976 = vperm.xlu1 %2133, %v3289_v62  }
 0x2d2   :  { %1987 = vmatpush3.bf16.msra.mxu1 %v684_v10  ;;  %2140 = vset.pattern.permute.xlu0 %v2819_v1  ;;  %v1359_v10 = vld [vmem:[#allocation30 + $0x30] sm:$0xff] }
 0x2d3   :  { %v2202_v11 = vpop.eup %2201  ;;  %1988 = vmatprep.subr.bf16.mxu1 %v685_v9  ;;  %1036 = vperm.xlu0 %2140, %v1032_v30   ;;  %v849_v28 = vpop.permute.xlu1 %848 }
 0x2d4   :  { %v2204_v12 = vpop.eup %2203 }
 0x2d5   :  { %v2206_v13 = vpop.eup %2205  ;;  %2135 = vset.pattern.permute.xlu1 %v2831_v32  ;;  %v1180_v32 = vld [vmem:[#allocation27 + $0x28] sm:$0xff] }
 0x2d6   :  { %v2208_v14 = vpop.eup %2207  ;;  %1989 = vmatpush3.bf16.msra.mxu1 %v685_v9  ;;  %v687_v15 = vpack.c.bf16 %v2206_v13, %v2202_v11  ;;  %996 = vperm.xlu1 %2135, %v3289_v62  }
 0x2d7   :  { %v686_v16 = vpack.c.bf16 %v2208_v14, %v2204_v12  ;;  %1085 = vperm.xlu0 %2140, %v1081_v31  }
 0x2d9   :  { %1990 = vmatprep.subr.bf16.mxu1 %v686_v16 }
 0x2da   :  { %1991 = vmatpush3.bf16.msra.mxu1 %v686_v16  ;;  %2136 = vset.pattern.permute.xlu1 %v2832_v34  ;;  %v844_v34 = vpop.permute.xlu0 %843 }
 0x2db   :  { %1992 = vmatprep.subr.bf16.mxu1 %v687_v15  ;;  %1106 = vperm.xlu0 %2140, %v1100_v33  }
 0x2dc   :  { %1006 = vperm.xlu1 %2136, %v3289_v62   ;;  %v1082_v62 = vld [vmem:[#allocation21] sm:$0x7] }
 0x2de   :  { %1993 = vmatpush3.bf16.msra.mxu1 %v687_v15  ;;  %v1361_v15 = vld [vmem:[#allocation30 + $0x40] sm:$0xff] }
 0x2df   :  { %2002 = vmatprep.subr.bf16.mxu1 %v2820_v20  ;;  %2143 = vset.pattern.permute.xlu0 %v2822_v21 }
 0x2e0   :  { %2138 = vset.pattern.permute.xlu1 %v2819_v1  ;;  %1121 = vperm.xlu0 %2143, %v1100_v33  }
 0x2e1   :  { %1995 = vmatmul.mubr.bf16.vlgmr.msra.gmra.mrb[0].mxu1 %v2158_v17  ;;  %1027 = vperm.xlu1 %2138, %v904_v35  }
 0x2e2   :  { %1998 = vmatprep.mubr.bf16.mxu1 %v2159_v18  ;;  %v1363_v18 = vld [vmem:[#allocation30 + $0x50] sm:$0xff] }
 0x2e4   :  { %2146 = vset.pattern.permute.xlu0 %v2823_v22 }
 0x2e5   :  { %2139 = vset.pattern.permute.xlu1 %v2822_v21  ;;  %1141 = vperm.xlu0 %2146, %v1101_v36  }
 0x2e6   :  { %1045 = vperm.xlu1 %2139, %v1032_v30  }
 0x2e9   :  { %1999 = vmatmul.mubr.bf16.gmra.mrb[4].mxu1 %v2160_v19  ;;  %2148 = vset.pattern.permute.xlu0 %v2819_v1 }
 0x2ea   :  { %2010 = vmatprep.mubr.msk.bf16.mxu1 %vm2821_vm1, %v2820_v20  ;;  %2141 = vset.pattern.permute.xlu1 %v2823_v22 }
 0x2eb   :  { %1058 = vperm.xlu1 %2141, %v1032_v30   ;;  %1185 = vperm.xlu0 %2148, %v1175_v29   ;;  %v1178_v30 = vld [vmem:[#allocation27 + $0x18] sm:$0xff] }
 0x2ef   :  { %2142 = vset.pattern.permute.xlu1 %v2819_v1  ;;  %1200 = vperm.xlu0 %2148, %v1178_v30  }
 0x2f0   :  { %1072 = vperm.xlu1 %2142, %v1033_v37  }
 0x2f3   :  { %1210 = vperm.xlu0 %2148, %v1180_v32  }
 0x2f4   :  { %1095 = vperm.xlu1 %2142, %v1082_v62  }
 0x2f8   :  { %1111 = vperm.xlu1 %2142, %v1101_v36  }
 0x2fc   :  { %2144 = vset.pattern.permute.xlu1 %v2822_v21 }
 0x2fd   :  { %1125 = vperm.xlu1 %2144, %v1101_v36  }
 0x301   :  { %2145 = vset.pattern.permute.xlu1 %v2823_v22 }
 0x302   :  { %1137 = vperm.xlu1 %2145, %v1100_v33   ;;  %v1182_v33 = vld [vmem:[#allocation27 + $0x38] sm:$0xff] }
 0x303   :  { %1220 = vperm.xlu0 %2148, %v1182_v33  }
 0x306   :  { %2147 = vset.pattern.permute.xlu1 %v2819_v1 }
 0x307   :  { %1154 = vperm.xlu1 %2147, %v1102_v38   ;;  %v910_v38 = vlaneseq }
 0x30b   :  { %1159 = vperm.xlu1 %2147, %v1103_v39   ;;  %v1354_v39 = vld [vmem:[#allocation30 + $0x8] sm:$0xff] }
 0x30c   :  { %1376 = vperm.xlu0 %2148, %v1354_v39  }
 0x30f   :  { %1190 = vperm.xlu1 %2147, %v1176_v40  }
 0x313   :  { %1195 = vperm.xlu1 %2147, %v1177_v42   ;;  %v3322_v42 = vshrl.u32 %v910_v38, 7 }
 0x317   :  { %1205 = vperm.xlu1 %2147, %v1179_v44  }
 0x31b   :  { %1215 = vperm.xlu1 %2147, %v1181_v47   ;;  %v3328_v47 = vsub.s32 1, %v3322_v42 }
 0x31f   :  { %1371 = vperm.xlu1 %2147, %v1353_v53  }
 0x323   :  { %1381 = vperm.xlu1 %2147, %v1355_v58  }
 0x327   :  { %1391 = vperm.xlu1 %2147, %v1357_v4  }
 0x32b   :  { %1401 = vperm.xlu1 %2147, %v1359_v10  }
 0x32f   :  { %1411 = vperm.xlu1 %2147, %v1361_v15   ;;  %v1364_v15 = vld [vmem:[#allocation30 + $0x58] sm:$0xff] }
 0x333   :  { %1421 = vperm.xlu1 %2147, %v1363_v18   ;;  %v917_v31 = vpop.permute.xlu1 %916 }
 0x337   :  { %1431 = vperm.xlu1 %2147, %v1365_v24   ;;  %v1366_v24 = vld [vmem:[#allocation30 + $0x68] sm:$0xff] }
 0x33b   :  { %1441 = vperm.xlu1 %2147, %v1367_v26  }
 0x3b4   :  { %v1996_v48 = vpop.f32.mrb[0].mxu1 }
 0x3b5   :  { %v803_v49 = vadd.f32 %v1996_v48, %v709_v45  ;;  %v794_v50 = vpop.f32.mrb[1].mxu1  ;;  %v3331_v48 = vsub.s32 2, %v3322_v42 }
 0x3b6   :  { %v795_v1 = vadd.f32 %v794_v50, %v699_v41  ;;  %v1997_v52 = vpop.f32.mrb[2].mxu1  ;;  %v908_v50 = vpop.permute.xlu0 %907 }
 0x3b7   :  { %2209 = vtanh.f32 %v803_v49  ;;  %v806_v54 = vadd.f32 %v1997_v52, %v714_v46  ;;  %v797_v55 = vpop.f32.mrb[3].mxu1  ;;  %v3325_v46 = vsub.s32 0, %v3322_v42  ;;  %v1358_v49 = vld [vmem:[#allocation30 + $0x28] sm:$0xff] }
 0x3b8   :  { %2211 = vtanh.f32 %v795_v1  ;;  %v798_v57 = vadd.f32 %v797_v55, %v704_v43  ;;  %v1356_v43 = vld [vmem:[#allocation30 + $0x18] sm:$0xff]  ;;  %v951_v55 = vsub.s32 4, %v3322_v42 }
 0x3b9   :  { %2213 = vtanh.f32 %v806_v54  ;;  %1386 = vperm.xlu0 %2148, %v1356_v43  }
 0x3ba   :  { %2215 = vtanh.f32 %v798_v57  ;;  %v927_v58 = vpop.permute.xlu0 %926 }
 0x3bc   :  { %v2000_v60 = vpop.f32.mrb[4].mxu1 }
 0x3bd   :  { %v819_v61 = vadd.f32 %v2000_v60, %v729_v59  ;;  %v810_v63 = vpop.f32.mrb[5].mxu1  ;;  %1396 = vperm.xlu0 %2148, %v1358_v49  }
 0x3be   :  { %v811_v2 = vadd.f32 %v810_v63, %v719_v51  ;;  %v2001_v3 = vpop.f32.mrb[6].mxu1  ;;  %v941_v51 = vsub.s32 3, %v3322_v42  ;;  %v961_v63 = vsub.s32 5, %v3322_v42 }
 0x3bf   :  { %2217 = vtanh.f32 %v819_v61  ;;  %v822_v5 = vadd.f32 %v2001_v3, %v734_v0  ;;  %v813_v6 = vpop.f32.mrb[7].mxu1  ;;  %v971_v3 = vsub.s32 6, %v3322_v42 }
 0x3c0   :  { %2219 = vtanh.f32 %v811_v2  ;;  %v814_v7 = vadd.f32 %v813_v6, %v724_v56  ;;  %v1360_v56 = vld [vmem:[#allocation30 + $0x38] sm:$0xff] }
 0x3c1   :  { %v2210_v8 = vpop.eup %2209  ;;  %2221 = vtanh.f32 %v822_v5  ;;  %1406 = vperm.xlu0 %2148, %v1360_v56   ;;  %v1362_v5 = vld [vmem:[#allocation30 + $0x48] sm:$0xff] }
 0x3c2   :  { %v2212_v9 = vpop.eup %2211  ;;  %2223 = vtanh.f32 %v814_v7 }
 0x3c3   :  { %v2214_v11 = vpop.eup %2213 }
 0x3c4   :  { %v2216_v12 = vpop.eup %2215  ;;  %v836_v13 = vpack.c.bf16 %v2214_v11, %v2210_v8  ;;  %v957_v11 = vpop.permute.xlu0 %956 }
 0x3c5   :  { %v835_v14 = vpack.c.bf16 %v2216_v12, %v2212_v9  ;;  %v981_v9 = vsub.s32 7, %v3322_v42  ;;  %1416 = vperm.xlu0 %2148, %v1362_v5  }
 0x3c7   :  { %2003 = vmatpush3.bf16.msra.mxu1 %v835_v14 }
 0x3c8   :  { %2004 = vmatprep.subr.bf16.mxu1 %v2820_v20  ;;  %v987_v26 = vpop.permute.xlu0 %986 }
 0x3c9   :  { %v2218_v16 = vpop.eup %2217  ;;  %1426 = vperm.xlu0 %2148, %v1364_v15  }
 0x3ca   :  { %v2220_v17 = vpop.eup %2219 }
 0x3cb   :  { %v2222_v19 = vpop.eup %2221  ;;  %2005 = vmatpush3.bf16.msra.mxu1 %v836_v13 }
 0x3cc   :  { %v2224_v21 = vpop.eup %2223  ;;  %2006 = vmatprep.subr.bf16.mxu1 %v2820_v20  ;;  %v838_v22 = vpack.c.bf16 %v2222_v19, %v2218_v16 }
 0x3cd   :  { %v837_v23 = vpack.c.bf16 %v2224_v21, %v2220_v17  ;;  %1436 = vperm.xlu0 %2148, %v1366_v24  }
 0x3cf   :  { %2007 = vmatpush3.bf16.msra.mxu1 %v837_v23 }
 0x3d0   :  { %2008 = vmatprep.subr.bf16.mxu1 %v2820_v20  ;;  %v937_v20 = vpop.permute.xlu1 %936 }
 0x3d3   :  { %2009 = vmatpush3.bf16.msra.mxu1 %v838_v22 }
 0x3d4   :  { %v947_v40 = vpop.permute.xlu1 %946 }
 0x3d6   :  { %2011 = vmatmul.mubr.msk.bf16.vlgmr.msra.gmra.mrb[8].mxu1 %vm856_vm2, %v2161_v25 }
 0x3d7   :  { %2016 = vmatprep.mubr.msk.bf16.mxu1 %vm1243_vm3, %v2162_v27 }
 0x3d8   :  { %v967_v44 = vpop.permute.xlu1 %966 }
 0x3dc   :  { %v977_v57 = vpop.permute.xlu1 %976 }
 0x3e0   :  { %v997_v10 = vpop.permute.xlu1 %996 }
 0x3e4   :  { %v1007_v25 = vpop.permute.xlu1 %1006 }
 0x4a9   :  { %v894_v35 = vpop.f32.mrb[8].mxu1 }
 0x4aa   :  { %v895_v36 = vadd.f32 %v894_v35, %v844_v34  ;;  %v2012_v37 = vpop.f32.mrb[9].mxu1 }
 0x4ab   :  { %v897_v62 = vpop.f32.mrb[10].mxu1  ;;  %v1017_v37 = vpop.permute.xlu0 %1016 }
 0x4ac   :  { %2225 = vtanh.f32 %v895_v36  ;;  %v2013_v41 = vpop.f32.mrb[11].mxu1  ;;  %v898_v45 = vadd.f32 %v897_v62, %v849_v28  ;;  %v1028_v36 = vpop.permute.xlu1 %1027 }
 0x4ae   :  { %2227 = vtanh.f32 %v898_v45 }
 0x4af   :  { %v1037_v49 = vpop.permute.xlu0 %1036 }
 0x4b0   :  { %v1046_v42 = vpop.permute.xlu1 %1045 }
 0x4b6   :  { %v2226_v1 = vpop.eup %2225 }
 0x4b7   :  { %v913_v52 = vrot.slane %v2226_v1, %v3325_v46  ;;  %v922_v53 = vrot.slane %v2226_v1, %v3328_v47  ;;  %v932_v54 = vrot.slane %v2226_v1, %v3331_v48  ;;  %v942_v61 = vrot.slane %v2226_v1, %v941_v51 }
 0x4b8   :  { %v952_v4 = vrot.slane %v2226_v1, %v951_v55  ;;  %v962_v8 = vrot.slane %v2226_v1, %v961_v63  ;;  %v972_v14 = vrot.slane %v2226_v1, %v971_v3  ;;  %v2228_v16 = vpop.eup %2227  ;;  %v982_v19 = vrot.slane %v2226_v1, %v981_v9  ;;  %v1086_v3 = vpop.permute.xlu0 %1085 }
 0x4b9   :  { %v914_v59 = vmul.f32 %v913_v52, %v908_v50  ;;  %v923_v60 = vmul.f32 %v922_v53, %v917_v31  ;;  %v933_v2 = vmul.f32 %v932_v54, %v927_v58  ;;  %v943_v7 = vmul.f32 %v942_v61, %v937_v20  ;;  %v1368_v20 = vld [vmem:[#allocation30 + $0x78] sm:$0xff] }
 0x4ba   :  { %v953_v13 = vmul.f32 %v952_v4, %v947_v40  ;;  %v963_v18 = vmul.f32 %v962_v8, %v957_v11  ;;  %v973_v22 = vmul.f32 %v972_v14, %v967_v44  ;;  %v992_v23 = vrot.slane %v2228_v16, %v3325_v46  ;;  %1446 = vperm.xlu0 %2148, %v1368_v20   ;;  %v1059_v44 = vpop.permute.xlu1 %1058  ;;  %v2165_v20 = vld [vmem:[#allocation26 + $0x18] sm:$0xff]  }
 0x4bb   :  { %v924_v0 = vadd.f32 %v923_v60, %v914_v59  ;;  %v983_v28 = vmul.f32 %v982_v19, %v977_v57  ;;  %v1002_v29 = vrot.slane %v2228_v16, %v3328_v47  ;;  %v1012_v32 = vrot.slane %v2228_v16, %v3331_v48 }
 0x4bc   :  { %v993_v31 = vmul.f32 %v992_v23, %v987_v26  ;;  %v1022_v35 = vrot.slane %v2228_v16, %v941_v51  ;;  %v1064_v45 = vrot.slane %v1059_v44, %v3325_v46  ;;  %v1051_v50 = vrot.slane %v1046_v42, %v3325_v46 }
 0x4bd   :  { %v934_v6 = vadd.f32 %v933_v2, %v924_v0  ;;  %v1003_v34 = vmul.f32 %v1002_v29, %v997_v10  ;;  %v1013_v38 = vmul.f32 %v1012_v32, %v1007_v25  ;;  %v1042_v51 = vrot.slane %v1037_v49, %v3325_v46  ;;  %v2164_v32 = vld [vmem:[#allocation26 + $0x10] sm:$0xff]  }
 0x4be   :  { %v1023_v40 = vmul.f32 %v1022_v35, %v1017_v37  ;;  %v1073_v1 = vpop.permute.xlu1 %1072 }
 0x4bf   :  { %v944_v12 = vadd.f32 %v943_v7, %v934_v6  ;;  %v1078_v57 = vrot.slane %v1073_v1, %v3325_v46  ;;  %v1107_v7 = vpop.permute.xlu0 %1106 }
 0x4c1   :  { %v954_v17 = vadd.f32 %v953_v13, %v944_v12 }
 0x4c2   :  { %v1096_v58 = vpop.permute.xlu1 %1095 }
 0x4c3   :  { %v964_v21 = vadd.f32 %v963_v18, %v954_v17  ;;  %v1122_v9 = vpop.permute.xlu0 %1121 }
 0x4c5   :  { %v974_v27 = vadd.f32 %v973_v22, %v964_v21 }
 0x4c6   :  { %v1112_v0 = vpop.permute.xlu1 %1111 }
 0x4c7   :  { %v984_v30 = vadd.f32 %v983_v28, %v974_v27  ;;  %v1142_v15 = vpop.permute.xlu0 %1141 }
 0x4c9   :  { %v994_v33 = vadd.f32 %v993_v31, %v984_v30  ;;  %v2163_v31 = vld [vmem:[#allocation26 + $0x8] sm:$0xff]  }
 0x4ca   :  { %v1126_v6 = vpop.permute.xlu1 %1125 }
 0x4cb   :  { %v1004_v62 = vadd.f32 %v1003_v34, %v994_v33  ;;  %v2166_v33 = vld [vmem:[#allocation29] sm:$0xff]   ;;  %v1186_v35 = vpop.permute.xlu0 %1185 }
 0x4cd   :  { %v1014_v39 = vadd.f32 %v1013_v38, %v1004_v62 }
 0x4ce   :  { %v1138_v8 = vpop.permute.xlu1 %1137 }
 0x4cf   :  { %v1024_v41 = vadd.f32 %v1023_v40, %v1014_v39  ;;  %v1201_v37 = vpop.permute.xlu0 %1200 }
 0x4d1   :  { %v1030_v43 = vadd.f32 %v1028_v36, %v1024_v41 }
 0x4d2   :  { %v1155_v14 = vpop.permute.xlu1 %1154 }
 0x4d3   :  { %2229 = vtanh.f32 %v1030_v43 }
 0x4d6   :  { %v1160_v27 = vpop.permute.xlu1 %1159 }
 0x4da   :  { %v1191_v34 = vpop.permute.xlu1 %1190 }
 0x4dd   :  { %v2230_v52 = vpop.eup %2229 }
 0x4de   :  { %v1052_v53 = vmul.f32 %v2230_v52, %v1051_v50  ;;  %v1065_v54 = vmul.f32 %v2230_v52, %v1064_v45  ;;  %v1043_v55 = vmul.f32 %v2230_v52, %v1042_v51  ;;  %v1196_v36 = vpop.permute.xlu1 %1195  ;;  %v1211_v45 = vpop.permute.xlu0 %1210 }
 0x4e0   :  { %v1054_v56 = vrot.slane %v1052_v53, 1  ;;  %v1067_v60 = vrot.slane %v1065_v54, 2 }
 0x4e2   :  { %v1056_v59 = vadd.f32 %v1054_v56, %v1043_v55  ;;  %v1206_v40 = vpop.permute.xlu1 %1205  ;;  %v1221_v53 = vpop.permute.xlu0 %1220 }
 0x4e4   :  { %v1069_v61 = vadd.f32 %v1067_v60, %v1056_v59 }
 0x4e6   :  { %v1079_v63 = vadd.f32 %v1078_v57, %v1069_v61  ;;  %v1216_v50 = vpop.permute.xlu1 %1215 }
 0x4e8   :  { %v1091_v2 = vrot.slane %v1079_v63, %v3325_v46  ;;  %1080 = vst [vmem:[#allocation35] sm:$0x1] %v1079_v63 }
 0x4ea   :  { %v1092_v4 = vmul.f32 %v1091_v2, %v1086_v3 }
 0x4ec   :  { %v1098_v5 = vadd.f32 %v1096_v58, %v1092_v4 }
 0x4ee   :  { %2231 = vtanh.f32 %v1098_v5 }
 0x4f8   :  { %v2232_v10 = vpop.eup %2231 }
 0x4f9   :  { %v1117_v11 = vrot.slane %v2232_v10, %v3325_v46  ;;  %v1131_v12 = vrot.slane %v2232_v10, %v3328_v47  ;;  %v1147_v13 = vrot.slane %v2232_v10, %v3331_v48  ;;  %v2168_v10 = vld [vmem:[#allocation29 + $0x10] sm:$0xff]  }
 0x4fb   :  { %v1118_v16 = vmul.f32 %v1117_v11, %v1107_v7  ;;  %v1119_v17 = vmul.f32 %v1117_v11, %v1112_v0  ;;  %v1132_v18 = vmul.f32 %v1131_v12, %v1122_v9  ;;  %v1133_v19 = vmul.f32 %v1131_v12, %v1126_v6  ;;  %v2167_v9 = vld [vmem:[#allocation29 + $0x8] sm:$0xff]   ;;  %v2169_v11 = vld [vmem:[#allocation29 + $0x18] sm:$0xff]   ;;  %v2170_v12 = vld [vmem:[#allocation29 + $0x20] sm:$0xff]  }
 0x4fc   :  { %v1148_v23 = vmul.f32 %v1147_v13, %v1138_v8  ;;  %v1149_v24 = vmul.f32 %v1147_v13, %v1142_v15  ;;  %v2171_v13 = vld [vmem:[#allocation29 + $0x28] sm:$0xff]   ;;  %v2173_v15 = vld [vmem:[#allocation29 + $0x38] sm:$0xff]  }
 0x4fd   :  { %v1134_v21 = vadd.f32 %v1132_v18, %v1118_v16  ;;  %v1135_v22 = vadd.f32 %v1133_v19, %v1119_v17  ;;  %v2174_v16 = vld [vmem:[#allocation32] sm:$0xff]   ;;  %v2175_v17 = vld [vmem:[#allocation32 + $0x8] sm:$0xff]   ;;  %v2176_v18 = vld [vmem:[#allocation32 + $0x10] sm:$0x1f]   ;;  %v1372_v19 = vpop.permute.xlu1 %1371 }
 0x4fe   :  { %2048 = vmatprep.subr.bf16.mxu0 %v2174_v16 }
 0x4ff   :  { %v1150_v25 = vadd.f32 %v1148_v23, %v1134_v21  ;;  %v1151_v26 = vadd.f32 %v1149_v24, %v1135_v22  ;;  %2049 = vmatpush3.bf16.xpose.msra.mxu0 %v2174_v16  ;;  %v1377_v21 = vpop.permute.xlu0 %1376 }
 0x500   :  { %2050 = vmatprep.subr.bf16.mxu0 %v2175_v17 }
 0x501   :  { %v1162_v28 = vadd.f32 %v1155_v14, %v1150_v25  ;;  %v1163_v29 = vadd.f32 %v1160_v27, %v1151_v26  ;;  %v2172_v14 = vld [vmem:[#allocation29 + $0x30] sm:$0xff]   ;;  %v1382_v22 = vpop.permute.xlu1 %1381 }
 0x503   :  { %2233 = vtanh.f32 %v1162_v28  ;;  %v1387_v23 = vpop.permute.xlu0 %1386 }
 0x504   :  { %2235 = vtanh.f32 %v1163_v29 }
 0x505   :  { %v1392_v24 = vpop.permute.xlu1 %1391 }
 0x507   :  { %2051 = vmatpush3.bf16.xpose.msra.mxu0 %v2175_v17  ;;  %v1397_v25 = vpop.permute.xlu0 %1396 }
 0x508   :  { %2052 = vmatprep.subr.bf16.mxu0 %v2176_v18 }
 0x509   :  { %v1402_v26 = vpop.permute.xlu1 %1401 }
 0x50d   :  { %v2234_v46 = vpop.eup %2233 }
 0x50e   :  { %v2236_v47 = vpop.eup %2235 }
 0x50f   :  { %v1174_v48 = vpack.c.bf16 %v2236_v47, %v2234_v46  ;;  %2053 = vmatpush3.bf16.xpose.msra.mxu0 %v2176_v18  ;;  %v1407_v46 = vpop.permute.xlu0 %1406 }
 0x511   :  { %2084 = vmatprep.subr.msk.bf16.mxu1 %vm1256_vm4, %v1174_v48  ;;  %v1258_v30 = vsel %vm1256_vm4, %v1174_v48, 0 }
 0x512   :  { %2015 = vmatpush3.bf16.msra.mxu1 %v1258_v30 }
 0x515   :  { %2017 = vmatmul.mubr.msk.bf16.vlgmr.msra.gmra.mrb[12].mxu1 %vm1243_vm3, %v2163_v31 }
 0x516   :  { %2020 = vmatprep.mubr.msk.bf16.mxu1 %vm1243_vm3, %v2164_v32 }
 0x51d   :  { %2021 = vmatmul.mubr.msk.bf16.gmra.mrb[16].mxu1 %vm1243_vm3, %v2165_v20  ;;  %v1412_v20 = vpop.permute.xlu1 %1411 }
 0x51e   :  { %2032 = vmatprep.mubr.msk.bf16.mxu1 %vm856_vm2, %v2166_v33  ;;  %v1417_v33 = vpop.permute.xlu0 %1416 }
 0x5e8   :  { %v2018_v62 = vpop.f32.mrb[12].mxu1 }
 0x5e9   :  { %v1303_v38 = vadd.f32 %v2018_v62, %v1196_v36  ;;  %v1294_v39 = vpop.f32.mrb[13].mxu1 }
 0x5ea   :  { %v1295_v41 = vadd.f32 %v1294_v39, %v1186_v35  ;;  %v2019_v42 = vpop.f32.mrb[14].mxu1 }
 0x5eb   :  { %2237 = vtanh.f32 %v1303_v38  ;;  %v1306_v43 = vadd.f32 %v2019_v42, %v1201_v37  ;;  %v1297_v44 = vpop.f32.mrb[15].mxu1 }
 0x5ec   :  { %2239 = vtanh.f32 %v1295_v41  ;;  %v1298_v49 = vadd.f32 %v1297_v44, %v1191_v34  ;;  %v1427_v44 = vpop.permute.xlu0 %1426 }
 0x5ed   :  { %2241 = vtanh.f32 %v1306_v43 }
 0x5ee   :  { %2243 = vtanh.f32 %v1298_v49 }
 0x5f0   :  { %v2022_v1 = vpop.f32.mrb[16].mxu1 }
 0x5f1   :  { %v1319_v51 = vadd.f32 %v2022_v1, %v1216_v50  ;;  %v1310_v52 = vpop.f32.mrb[17].mxu1 }
 0x5f2   :  { %v1311_v54 = vadd.f32 %v1310_v52, %v1206_v40  ;;  %v2023_v55 = vpop.f32.mrb[18].mxu1  ;;  %v1422_v40 = vpop.permute.xlu1 %1421 }
 0x5f3   :  { %2245 = vtanh.f32 %v1319_v51  ;;  %v1322_v56 = vadd.f32 %v2023_v55, %v1221_v53  ;;  %v1313_v57 = vpop.f32.mrb[19].mxu1 }
 0x5f4   :  { %2247 = vtanh.f32 %v1311_v54  ;;  %v1314_v58 = vadd.f32 %v1313_v57, %v1211_v45 }
 0x5f5   :  { %v2238_v59 = vpop.eup %2237  ;;  %2249 = vtanh.f32 %v1322_v56 }
 0x5f6   :  { %v2240_v60 = vpop.eup %2239  ;;  %2251 = vtanh.f32 %v1314_v58  ;;  %v1432_v54 = vpop.permute.xlu1 %1431 }
 0x5f7   :  { %v2242_v61 = vpop.eup %2241 }
 0x5f8   :  { %v2244_v63 = vpop.eup %2243  ;;  %v1350_v0 = vpack.c.bf16 %v2242_v61, %v2238_v59  ;;  %v1437_v59 = vpop.permute.xlu0 %1436 }
 0x5f9   :  { %v1349_v2 = vpack.c.bf16 %v2244_v63, %v2240_v60 }
 0x5fb   :  { %2024 = vmatprep.subr.bf16.mxu1 %v1349_v2 }
 0x5fc   :  { %2025 = vmatpush3.bf16.msra.mxu1 %v1349_v2 }
 0x5fd   :  { %v2246_v3 = vpop.eup %2245  ;;  %2026 = vmatprep.subr.bf16.mxu1 %v1350_v0 }
 0x5fe   :  { %v2248_v4 = vpop.eup %2247 }
 0x5ff   :  { %v2250_v5 = vpop.eup %2249 }
 0x600   :  { %v2252_v6 = vpop.eup %2251  ;;  %2027 = vmatpush3.bf16.msra.mxu1 %v1350_v0  ;;  %v1352_v7 = vpack.c.bf16 %v2250_v5, %v2246_v3  ;;  %v1442_v3 = vpop.permute.xlu1 %1441 }
 0x601   :  { %v1351_v8 = vpack.c.bf16 %v2252_v6, %v2248_v4 }
 0x603   :  { %2028 = vmatprep.subr.bf16.mxu1 %v1351_v8 }
 0x604   :  { %2029 = vmatpush3.bf16.msra.mxu1 %v1351_v8 }
 0x605   :  { %2030 = vmatprep.subr.bf16.mxu1 %v1352_v7 }
 0x608   :  { %2031 = vmatpush3.bf16.msra.mxu1 %v1352_v7 }
 0x609   :  { %2070 = vmatprep.subr.bf16.mxu1 %v2174_v16 }
 0x60b   :  { %2033 = vmatmul.mubr.msk.bf16.vlgmr.msra.gmra.mrb[20].mxu1 %vm856_vm2, %v2167_v9  ;;  %v1447_v9 = vpop.permute.xlu0 %1446 }
 0x60c   :  { %2036 = vmatprep.mubr.msk.bf16.mxu1 %vm856_vm2, %v2168_v10 }
 0x611   :  { %2073 = vmatpush3.bf16.xpose.msra.mxu1 %v2174_v16 }
 0x612   :  { %2071 = vmatprep.subr.bf16.mxu1 %v2175_v17 }
 0x613   :  { %2037 = vmatmul.mubr.msk.bf16.gmra.mrb[24].mxu1 %vm856_vm2, %v2169_v11 }
 0x614   :  { %2040 = vmatprep.mubr.msk.bf16.mxu1 %vm856_vm2, %v2170_v12 }
 0x619   :  { %2074 = vmatpush3.bf16.xpose.msra.mxu1 %v2175_v17 }
 0x61a   :  { %2072 = vmatprep.subr.bf16.mxu1 %v2176_v18 }
 0x61b   :  { %2041 = vmatmul.mubr.msk.bf16.gmra.mrb[28].mxu1 %vm856_vm2, %v2171_v13 }
 0x61c   :  { %2044 = vmatprep.mubr.msk.bf16.mxu1 %vm856_vm2, %v2172_v14 }
 0x621   :  { %2075 = vmatpush3.bf16.xpose.msra.mxu1 %v2176_v18 }
 0x623   :  { %2045 = vmatmul.mubr.msk.bf16.gmra.mrb[32].mxu1 %vm856_vm2, %v2173_v15 }
 0x6de   :  { %v2034_v27 = vpop.f32.mrb[20].mxu1 }
 0x6df   :  { %v1556_v28 = vadd.f32 %v2034_v27, %v1382_v22  ;;  %v1547_v29 = vpop.f32.mrb[21].mxu1 }
 0x6e0   :  { %v1548_v47 = vadd.f32 %v1547_v29, %v1372_v19  ;;  %v2035_v48 = vpop.f32.mrb[22].mxu1 }
 0x6e1   :  { %2253 = vtanh.f32 %v1556_v28  ;;  %v1559_v30 = vadd.f32 %v2035_v48, %v1387_v23  ;;  %v1550_v31 = vpop.f32.mrb[23].mxu1 }
 0x6e2   :  { %2255 = vtanh.f32 %v1548_v47  ;;  %v1551_v32 = vadd.f32 %v1550_v31, %v1377_v21 }
 0x6e3   :  { %2257 = vtanh.f32 %v1559_v30 }
 0x6e4   :  { %2259 = vtanh.f32 %v1551_v32 }
 0x6e6   :  { %v2038_v34 = vpop.f32.mrb[24].mxu1 }
 0x6e7   :  { %v1572_v35 = vadd.f32 %v2038_v34, %v1402_v26  ;;  %v1563_v36 = vpop.f32.mrb[25].mxu1 }
 0x6e8   :  { %v1564_v37 = vadd.f32 %v1563_v36, %v1392_v24  ;;  %v2039_v62 = vpop.f32.mrb[26].mxu1 }
 0x6e9   :  { %2261 = vtanh.f32 %v1572_v35  ;;  %v1575_v38 = vadd.f32 %v2039_v62, %v1407_v46  ;;  %v1566_v39 = vpop.f32.mrb[27].mxu1 }
 0x6ea   :  { %2263 = vtanh.f32 %v1564_v37  ;;  %v1567_v41 = vadd.f32 %v1566_v39, %v1397_v25 }
 0x6eb   :  { %v2254_v42 = vpop.eup %2253  ;;  %2265 = vtanh.f32 %v1575_v38 }
 0x6ec   :  { %v2256_v43 = vpop.eup %2255  ;;  %2267 = vtanh.f32 %v1567_v41 }
 0x6ed   :  { %v2258_v45 = vpop.eup %2257 }
 0x6ee   :  { %v2260_v49 = vpop.eup %2259  ;;  %v2042_v50 = vpop.f32.mrb[28].mxu1  ;;  %v1634_v1 = vpack.c.bf16 %v2258_v45, %v2254_v42 }
 0x6ef   :  { %v1588_v51 = vadd.f32 %v2042_v50, %v1422_v40  ;;  %v1579_v52 = vpop.f32.mrb[29].mxu1  ;;  %v1633_v53 = vpack.c.bf16 %v2260_v49, %v2256_v43 }
 0x6f0   :  { %v1580_v55 = vadd.f32 %v1579_v52, %v1412_v20  ;;  %v2043_v56 = vpop.f32.mrb[30].mxu1 }
 0x6f1   :  { %2269 = vtanh.f32 %v1588_v51  ;;  %v1591_v57 = vadd.f32 %v2043_v56, %v1427_v44  ;;  %v1582_v58 = vpop.f32.mrb[31].mxu1  ;;  %1647 = vxpose.xlu1.c.b16.start [1/8] %v1633_v53, 128 }
 0x6f2   :  { %2271 = vtanh.f32 %v1580_v55  ;;  %v1583_v60 = vadd.f32 %v1582_v58, %v1417_v33 }
 0x6f3   :  { %v2262_v61 = vpop.eup %2261  ;;  %2273 = vtanh.f32 %v1591_v57 }
 0x6f4   :  { %v2264_v63 = vpop.eup %2263  ;;  %2275 = vtanh.f32 %v1583_v60 }
 0x6f5   :  { %v2266_v0 = vpop.eup %2265  ;;  %1648 = vxpose.xlu1.c.b16.cont [2/8] %v1634_v1, 128 }
 0x6f6   :  { %v2268_v2 = vpop.eup %2267  ;;  %v2046_v4 = vpop.f32.mrb[32].mxu1  ;;  %v1636_v5 = vpack.c.bf16 %v2266_v0, %v2262_v61 }
 0x6f7   :  { %v1604_v6 = vadd.f32 %v2046_v4, %v1442_v3  ;;  %v1595_v7 = vpop.f32.mrb[33].mxu1  ;;  %v1635_v8 = vpack.c.bf16 %v2268_v2, %v2264_v63 }
 0x6f8   :  { %v1596_v10 = vadd.f32 %v1595_v7, %v1432_v54  ;;  %v2047_v11 = vpop.f32.mrb[34].mxu1 }
 0x6f9   :  { %2277 = vtanh.f32 %v1604_v6  ;;  %v1607_v12 = vadd.f32 %v2047_v11, %v1447_v9  ;;  %v1598_v13 = vpop.f32.mrb[35].mxu1  ;;  %1649 = vxpose.xlu1.c.b16.cont [3/8] %v1635_v8, 128 }
 0x6fa   :  { %2279 = vtanh.f32 %v1596_v10  ;;  %v1599_v14 = vadd.f32 %v1598_v13, %v1437_v59 }
 0x6fb   :  { %v2270_v15 = vpop.eup %2269  ;;  %2281 = vtanh.f32 %v1607_v12 }
 0x6fc   :  { %v2272_v16 = vpop.eup %2271  ;;  %2283 = vtanh.f32 %v1599_v14 }
 0x6fd   :  { %v2274_v17 = vpop.eup %2273  ;;  %1650 = vxpose.xlu1.c.b16.cont [4/8] %v1636_v5, 128 }
 0x6fe   :  { %v2276_v18 = vpop.eup %2275  ;;  %v1638_v19 = vpack.c.bf16 %v2274_v17, %v2270_v15 }
 0x6ff   :  { %v1637_v21 = vpack.c.bf16 %v2276_v18, %v2272_v16 }
 0x701   :  { %1651 = vxpose.xlu1.c.b16.cont [5/8] %v1637_v21, 128 }
 0x703   :  { %v2278_v22 = vpop.eup %2277 }
 0x704   :  { %v2280_v23 = vpop.eup %2279 }
 0x705   :  { %v2282_v24 = vpop.eup %2281  ;;  %1652 = vxpose.xlu1.c.b16.cont [6/8] %v1638_v19, 128 }
 0x706   :  { %v2284_v25 = vpop.eup %2283  ;;  %v1640_v26 = vpack.c.bf16 %v2282_v24, %v2278_v22 }
 0x707   :  { %v1639_v27 = vpack.c.bf16 %v2284_v25, %v2280_v23 }
 0x709   :  { %1653 = vxpose.xlu1.c.b16.cont [7/8] %v1639_v27, 128 }
 0x70d   :  { %1654 = vxpose.xlu1.c.b16.end [8/8] %v1640_v26, 128 }
 0x757   :  { %v1655_v28 = vpop.trf.xlu1 }
 0x758   :  { %2054 = vmatprep.mubr.bf16.mxu0 %v1655_v28 }
 0x75b   :  { %v1656_v29 = vpop.trf.xlu1 }
 0x75c   :  { %2055 = vmatmul.mubr.bf16.vlgmr.msra.gmra.mrb[16].mxu0 %v1656_v29 }
 0x75f   :  { %v1657_v46 = vpop.trf.xlu1 }
 0x760   :  { %2058 = vmatprep.mubr.bf16.mxu0 %v1657_v46 }
 0x763   :  { %v1658_v47 = vpop.trf.xlu1 }
 0x764   :  { %2059 = vmatmul.mubr.bf16.gmra.mrb[20].mxu0 %v1658_v47 }
 0x767   :  { %v1659_v48 = vpop.trf.xlu1 }
 0x768   :  { %2062 = vmatprep.mubr.bf16.mxu0 %v1659_v48 }
 0x76b   :  { %v1660_v30 = vpop.trf.xlu1 }
 0x76c   :  { %2063 = vmatmul.mubr.bf16.gmra.mrb[24].mxu0 %v1660_v30 }
 0x76f   :  { %v1661_v31 = vpop.trf.xlu1 }
 0x770   :  { %2066 = vmatprep.mubr.bf16.mxu1 %v1661_v31 }
 0x773   :  { %v1662_v32 = vpop.trf.xlu1 }
 0x774   :  { %2067 = vmatmul.mubr.bf16.vlgmr.msra.gmra.mrb[36].mxu1 %v1662_v32 }
 0x775   :  { %2736 = shalt.err (!%p2733_p10)
}
 0x776   :  { %s3454_s22 = sld [smem:[#allocation58_spill]] }
 0x77c   :  { %s2737_s25 = scalar_lea.hbm %s3454_s22, 16 }
 0x77d   :  { %p2738_p11 = scmp.ne.s32.totalorder %s3454_s22, %s2737_s25  ;;  %p2741_p12 = scmp.lt.u32.totalorder %s2737_s25, %s3454_s22 }
 0x77f   :  { %p2743_p13 = pnand %p2741_p12, %p2738_p11 }
 0x781   :  { %2746 = shalt.err (!%p2743_p13)
}
 0x782   :  { %1803 = dma.vmem_to_hbm [thread:$0]  %s1801_s2, 16, %s3454_s22, [#allocation5]   ;;  %v1881_v20 = vld [vmem:[#allocation33] ss:$0 sm:$0xff] }
 0x783   :  { %s2834_s13 = smov [#allocation36]  }
 0x784   :  { %s1809_s17 = sshll.u32 %s2834_s13, 4  ;;  %s1810_s17 = int_to_ptr.vmem [resolvable:$true] %s1809_s17 }
 0x785   :  { %s2747_s27 = scalar_lea.vmem %s1810_s17, 2048  ;;  %p2752_p1 = scmp.lt.s32.totalorder %s1810_s17, %s1810_s17 }
 0x786   :  { %p2748_p0 = scmp.ne.s32.totalorder %s1810_s17, %s2747_s27  ;;  %p2753_p2 = scmp.lt.s32.totalorder %s2747_s27, %s2747_s27 }
 0x788   :  { %p2754_p3 = por %p2753_p2, %p2752_p1 }
 0x78a   :  { %p2755_p4 = pnand %p2754_p3, %p2748_p0 }
 0x82f   :  { %v2056_v33 = vpop.f32.mrb[16].mxu0 }
 0x830   :  { %v1724_v34 = vadd.f32 %v2056_v33, %v1881_v20  ;;  %v1715_v35 = vpop.f32.mrb[17].mxu0 }
 0x831   :  { %v1716_v36 = vadd.f32 %v1881_v20, %v1715_v35  ;;  %v2057_v37 = vpop.f32.mrb[18].mxu0 }
 0x832   :  { %1780 = vst.msk [vmem:[#allocation36 + $0x10] sm:$0xff] %vm510_vm0, %v1724_v34  ;;  %v1727_v62 = vadd.f32 %v2057_v37, %v1881_v20  ;;  %v1718_v38 = vpop.f32.mrb[19].mxu0 }
 0x833   :  { %1778 = vst.msk [vmem:[#allocation36] sm:$0xff] %vm510_vm0, %v1716_v36  ;;  %v1719_v39 = vadd.f32 %v1881_v20, %v1718_v38 }
 0x834   :  { %1781 = vst.msk [vmem:[#allocation36 + $0x18] sm:$0xff] %vm510_vm0, %v1727_v62 }
 0x835   :  { %1779 = vst.msk [vmem:[#allocation36 + $0x8] sm:$0xff] %vm510_vm0, %v1719_v39 }
 0x837   :  { %v2060_v40 = vpop.f32.mrb[20].mxu0 }
 0x838   :  { %v1740_v41 = vadd.f32 %v2060_v40, %v1881_v20  ;;  %v1731_v42 = vpop.f32.mrb[21].mxu0 }
 0x839   :  { %v1732_v43 = vadd.f32 %v1881_v20, %v1731_v42  ;;  %v2061_v44 = vpop.f32.mrb[22].mxu0 }
 0x83a   :  { %1784 = vst.msk [vmem:[#allocation36 + $0x30] sm:$0xff] %vm510_vm0, %v1740_v41  ;;  %v1743_v45 = vadd.f32 %v2061_v44, %v1881_v20  ;;  %v1734_v49 = vpop.f32.mrb[23].mxu0 }
 0x83b   :  { %1782 = vst.msk [vmem:[#allocation36 + $0x20] sm:$0xff] %vm510_vm0, %v1732_v43  ;;  %v1735_v50 = vadd.f32 %v1881_v20, %v1734_v49 }
 0x83c   :  { %1785 = vst.msk [vmem:[#allocation36 + $0x38] sm:$0xff] %vm510_vm0, %v1743_v45 }
 0x83d   :  { %1783 = vst.msk [vmem:[#allocation36 + $0x28] sm:$0xff] %vm510_vm0, %v1735_v50 }
 0x83f   :  { %v2064_v1 = vpop.f32.mrb[24].mxu0 }
 0x840   :  { %v1756_v51 = vadd.f32 %v2064_v1, %v1881_v20  ;;  %v1747_v52 = vpop.f32.mrb[25].mxu0 }
 0x841   :  { %v1748_v53 = vadd.f32 %v1881_v20, %v1747_v52  ;;  %v2065_v54 = vpop.f32.mrb[26].mxu0 }
 0x842   :  { %1788 = vst.msk [vmem:[#allocation36 + $0x50] sm:$0xff] %vm510_vm0, %v1756_v51  ;;  %v1759_v55 = vadd.f32 %v2065_v54, %v1881_v20  ;;  %v1750_v56 = vpop.f32.mrb[27].mxu0 }
 0x843   :  { %1786 = vst.msk [vmem:[#allocation36 + $0x40] sm:$0xff] %vm510_vm0, %v1748_v53  ;;  %v1751_v57 = vadd.f32 %v1881_v20, %v1750_v56 }
 0x844   :  { %1789 = vst.msk [vmem:[#allocation36 + $0x58] sm:$0xff] %vm510_vm0, %v1759_v55 }
 0x845   :  { %1787 = vst.msk [vmem:[#allocation36 + $0x48] sm:$0xff] %vm510_vm0, %v1751_v57 }
 0x847   :  { %v2068_v58 = vpop.f32.mrb[36].mxu1 }
 0x848   :  { %v1772_v59 = vadd.f32 %v2068_v58, %v1881_v20  ;;  %v1763_v60 = vpop.f32.mrb[37].mxu1 }
 0x849   :  { %v1764_v61 = vadd.f32 %v1881_v20, %v1763_v60  ;;  %v2069_v63 = vpop.f32.mrb[38].mxu1 }
 0x84a   :  { %1792 = vst.msk [vmem:[#allocation36 + $0x70] sm:$0xff] %vm510_vm0, %v1772_v59  ;;  %v1775_v0 = vadd.f32 %v2069_v63, %v1881_v20  ;;  %v1766_v2 = vpop.f32.mrb[39].mxu1 }
 0x84b   :  { %1790 = vst.msk [vmem:[#allocation36 + $0x60] sm:$0xff] %vm510_vm0, %v1764_v61  ;;  %v1767_v3 = vadd.f32 %v1881_v20, %v1766_v2 }
 0x84c   :  { %1793 = vst.msk [vmem:[#allocation36 + $0x78] sm:$0xff] %vm510_vm0, %v1775_v0 }
 0x84d   :  { %1791 = vst.msk [vmem:[#allocation36 + $0x68] sm:$0xff] %vm510_vm0, %v1767_v3 }
 0x84e   :  { %2758 = shalt.err (!%p2755_p4)
}
 0x84f   :  { %s3455_s23 = sld [smem:[#allocation59_spill]] }
 0x855   :  { %s2759_s4 = scalar_lea.hbm %s3455_s23, 2048 }
 0x856   :  { %p2760_p5 = scmp.ne.s32.totalorder %s3455_s23, %s2759_s4  ;;  %p2763_p6 = scmp.lt.u32.totalorder %s2759_s4, %s3455_s23 }
 0x858   :  { %p2765_p7 = pnand %p2763_p6, %p2760_p5 }
 0x85a   :  { %2768 = shalt.err (!%p2765_p7)
}
 0x85b   :  { %1815 = dma.vmem_to_hbm [thread:$0]  %s1810_s17, 2048, %s3455_s23, [#allocation37], %s2805_s24, %s2805_s24, %s2806_s5  }
 0x85c   :  { %2791 = dma.done.wait [#allocation5], 16  }
 0x85d   :  { %2792 = vsyncadd [#allocation5], 4294967280 }
 0x85e   :  { %2793 = dma.done.wait [#allocation37], 2048  }
 0x85f   :  { %2794 = vsyncadd [#allocation37], 4294965248 }
 0x860   :  { %1822 = vsyncpa [#allocation4], 1 }
 0x861   :  { %1823 = vsyncpa [#allocation7], 1 }
 0x862   :  { %1824 = vsyncpa [#allocation10], 1 }
 0x863   :  { %1825 = vsyncpa [#allocation13], 1 }
 0x864   :  { %1826 = vsyncpa [#allocation16], 1 }
 0x865   :  { %1827 = vsyncpa [#allocation19], 1 }
 0x866   :  { %1828 = vsyncpa [#allocation22], 1 }
 0x867   :  { %1829 = vsyncpa [#allocation25], 1 }
 0x868   :  { %1830 = vsyncpa [#allocation28], 1 }
 0x869   :  { %1831 = vsyncpa [#allocation31], 1 }
 0x86a   :  { %1832 = vsyncpa [#allocation34], 1 }
 0x86b   :  { %1833 = vsyncpa [#allocation5], 1 }
 0x86c   :  { %1834 = vsyncpa [#allocation37], 1 }

</bundles_post_ra>
